<compile_context>
chip_gen: v7x
topology: tpu7x:2x2x1
jax: 0.10.0
libtpu: 0.0.40
codegen_flags: <defaults>
</compile_context>

<pallas_src>
import functools

import jax
import jax.numpy as jnp
from jax import lax
from jax.experimental import pallas as pl
from jax.experimental.pallas import tpu as pltpu

F32 = jnp.float32
BF16 = jnp.bfloat16

ETYPES = ["drug_drug", "drug_disease", "disease_drug", "disease_disease"]
SUBNET_RELS = ["drug_drug", "drug_disease", "disease_disease"]
REL_SRC_DST = {
    "drug_drug": ("drug", "drug"),
    "drug_disease": ("drug", "disease"),
    "disease_drug": ("disease", "drug"),
    "disease_disease": ("disease", "disease"),
}

# True scalars travel through SMEM, not a padded (8,128) VMEM tile.
SMEM_SPEC = pl.BlockSpec(memory_space=pltpu.MemorySpace.SMEM)


def _round_up(x, m):
    return ((x + m - 1) // m) * m


def _row_tile(n):
    # 128-row tiles when they divide evenly, otherwise one full block.
    # TODO(synk): pad ragged row counts to a tile multiple for very large N.
    return 128 if (n % 128 == 0) else n


# ----------------------------------------------------------------------------
# Kernel 1: tiled matmul (bf16 MXU operands) with fused scale/shift/PReLU
# ----------------------------------------------------------------------------

def _matmul_epilogue_kernel(a_ref, b_ref, scale_ref, shift_ref, alpha_ref,
                            o_ref, acc_ref):
    k = pl.program_id(2)

    @pl.when(k == 0)
    def _():
        acc_ref[...] = jnp.zeros_like(acc_ref)

    acc_ref[...] += jnp.dot(a_ref[...], b_ref[...],
                            preferred_element_type=jnp.float32)

    @pl.when(k == pl.num_programs(2) - 1)
    def _():
        y = acc_ref[...] * scale_ref[...] + shift_ref[...]
        a = alpha_ref[0]
        o_ref[...] = jnp.where(y >= 0.0, y, a * y)   # PReLU (alpha=1 -> id)


def fused_matmul(a, b, scale=None, shift=None, alpha=1.0):
    """PReLU_alpha((A @ B) * scale + shift), bf16 MXU operands, f32 accum.

    Inputs are padded to tile multiples (128-lane aligned), so there is no
    single-full-block ragged fallback; result is sliced back to (M, N).
    """
    M, K = a.shape
    _, N = b.shape
    tm = min(256, _round_up(M, 8))
    tn = min(256, _round_up(N, 128))
    tk = min(512, _round_up(K, 128))
    Mp, Kp, Np = _round_up(M, tm), _round_up(K, tk), _round_up(N, tn)

    a_p = jnp.pad(a.astype(BF16), ((0, Mp - M), (0, Kp - K)))
    b_p = jnp.pad(b.astype(BF16), ((0, Kp - K), (0, Np - N)))
    if scale is None:
        scale = jnp.ones((N,), F32)
    if shift is None:
        shift = jnp.zeros((N,), F32)
    scale_p = jnp.pad(jnp.asarray(scale, F32).reshape(1, N),
                      ((0, 0), (0, Np - N)), constant_values=1.0)
    shift_p = jnp.pad(jnp.asarray(shift, F32).reshape(1, N),
                      ((0, 0), (0, Np - N)))
    alpha1 = jnp.asarray(alpha, F32).reshape(1)

    out = pl.pallas_call(
        _matmul_epilogue_kernel,
        out_shape=jax.ShapeDtypeStruct((Mp, Np), F32),
        grid=(Mp // tm, Np // tn, Kp // tk),
        in_specs=[
            pl.BlockSpec((tm, tk), lambda i, j, k: (i, k)),
            pl.BlockSpec((tk, tn), lambda i, j, k: (k, j)),
            pl.BlockSpec((1, tn), lambda i, j, k: (0, j)),
            pl.BlockSpec((1, tn), lambda i, j, k: (0, j)),
            SMEM_SPEC,
        ],
        out_specs=pl.BlockSpec((tm, tn), lambda i, j, k: (i, j)),
        scratch_shapes=[pltpu.VMEM((tm, tn), jnp.float32)],
        compiler_params=pltpu.CompilerParams(
            dimension_semantics=("parallel", "parallel", "arbitrary")),
    )(a_p, b_p, scale_p, shift_p, alpha1)
    return out[:M, :N]


# ----------------------------------------------------------------------------
# Kernel 2: fused HeteroGCN layer (per destination ntype)
#   grid = (dst row tiles [parallel], relations [arbitrary])
#   acc += A_norm_r[tile] @ (X_r W_r) + b_r  then BN(eval) scale/shift + PReLU
# ----------------------------------------------------------------------------

def _hetero_gcn_kernel(adj_ref, x_ref, w_ref, b_ref, scale_ref, shift_ref,
                       alpha_ref, o_ref, acc_ref):
    r = pl.program_id(1)

    @pl.when(r == 0)
    def _():
        acc_ref[...] = jnp.zeros_like(acc_ref)

    # bf16 MXU operands, f32 accumulation.
    xw = jnp.dot(x_ref[0], w_ref[0], preferred_element_type=jnp.float32)
    acc_ref[...] += (jnp.dot(adj_ref[0], xw.astype(jnp.bfloat16),
                             preferred_element_type=jnp.float32) + b_ref[0])

    @pl.when(r == pl.num_programs(1) - 1)
    def _():
        y = acc_ref[...] * scale_ref[...] + shift_ref[...]
        a = alpha_ref[0]
        o_ref[...] = jnp.where(y >= 0.0, y, a * y)


def hetero_gcn_call(adj_stack, x_stack, w_stack, b_stack, scale, shift, alpha):
    R, Nd, Ns = adj_stack.shape
    F = x_stack.shape[-1]
    Fp = _round_up(F, 128)          # lane-dense stores / MXU output lanes
    tm = _row_tile(Nd)
    # TODO(synk): also tile the Ns (source) axis for very large graphs so the
    # adjacency tile + XW stay within the v7x 64 MiB VMEM budget.

    x_p = jnp.pad(x_stack.astype(BF16), ((0, 0), (0, 0), (0, Fp - F)))
    w_p = jnp.pad(w_stack.astype(BF16), ((0, 0), (0, Fp - F), (0, Fp - F)))
    b_p = jnp.pad(b_stack.astype(F32), ((0, 0), (0, 0), (0, Fp - F)))
    scale_p = jnp.pad(jnp.asarray(scale, F32).reshape(1, F),
                      ((0, 0), (0, Fp - F)), constant_values=1.0)
    shift_p = jnp.pad(jnp.asarray(shift, F32).reshape(1, F),
                      ((0, 0), (0, Fp - F)))
    alpha1 = jnp.asarray(alpha, F32).reshape(1)

    out = pl.pallas_call(
        _hetero_gcn_kernel,
        out_shape=jax.ShapeDtypeStruct((Nd, Fp), F32),
        grid=(Nd // tm, R),
        in_specs=[
            pl.BlockSpec((1, tm, Ns), lambda i, r: (r, i, 0)),
            pl.BlockSpec((1, Ns, Fp), lambda i, r: (r, 0, 0)),
            pl.BlockSpec((1, Fp, Fp), lambda i, r: (r, 0, 0)),
            pl.BlockSpec((1, 1, Fp), lambda i, r: (r, 0, 0)),
            pl.BlockSpec((1, Fp), lambda i, r: (0, 0)),
            pl.BlockSpec((1, Fp), lambda i, r: (0, 0)),
            SMEM_SPEC,
        ],
        out_specs=pl.BlockSpec((tm, Fp), lambda i, r: (i, 0)),
        scratch_shapes=[pltpu.VMEM((tm, Fp), jnp.float32)],
        compiler_params=pltpu.CompilerParams(
            dimension_semantics=("parallel", "arbitrary")),
    )(adj_stack.astype(BF16), x_p, w_p, b_p, scale_p, shift_p, alpha1)
    return out[:, :F]


def build_group_stacks(adjn, rels, n_nodes):
    """Pad/stack the normalized adjacencies ONCE per relation group (bf16)."""
    by_dst = {}
    for rel in rels:
        src, dst = REL_SRC_DST[rel]
        by_dst.setdefault(dst, []).append(rel)
    stacks = {}
    for dst, rlist in by_dst.items():
        Ns = max(n_nodes[REL_SRC_DST[r][0]] for r in rlist)
        adj_stack = jnp.stack([
            jnp.pad(adjn[r], ((0, 0), (0, Ns - n_nodes[REL_SRC_DST[r][0]])))
            for r in rlist]).astype(BF16)
        stacks[dst] = (rlist, adj_stack, Ns)
    return stacks


def hetero_gcn_layer(stacks, h, rel_params, scale, shift, alpha,
                     n_nodes, hidden):
    """Node_Embedding: HeteroGraphConv(sum) + eval-BN + PReLU (dropout = id)."""
    out = {}
    for dst, (rlist, adj_stack, Ns) in stacks.items():
        x_stack = jnp.stack([
            jnp.pad(h[REL_SRC_DST[r][0]].astype(F32),
                    ((0, Ns - n_nodes[REL_SRC_DST[r][0]]), (0, 0)))
            for r in rlist])
        w_stack = jnp.stack([rel_params[r]["W"] for r in rlist])
        b_stack = jnp.stack([rel_params[r]["b"].reshape(1, hidden)
                             for r in rlist])
        out[dst] = hetero_gcn_call(adj_stack, x_stack, w_stack, b_stack,
                                   scale, shift, alpha)
    return out


# ----------------------------------------------------------------------------
# Kernel 3: fused GATConv (masked softmax + bias + PReLU + head-mean + PReLU)
#   grid = (dst row tiles [parallel], heads [arbitrary]); head is a block dim.
# ----------------------------------------------------------------------------

def gat_attention(wh, gp, mask, H, F):
    """wh: [N, H*F] projected features (f32).  Returns [N, F]."""
    N, HF = wh.shape
    Fp = _round_up(F, 128)
    tm = _row_tile(N)
    # TODO(synk): for very large N, also tile the source axis with a
    # flash-style online-softmax accumulator instead of full [tm, N] rows.

    feat3 = wh.reshape(N, H, F)
    el = jnp.einsum("nhf,hf->hn", feat3, gp["attn_l"]).astype(F32)   # src
    er = jnp.einsum("nhf,hf->hn", feat3, gp["attn_r"]).astype(F32)   # dst
    el3 = el[:, None, :]                                             # [H,1,N]
    er3 = er[:, :, None]                                             # [H,N,1]
    wh3 = jnp.pad(feat3.transpose(1, 0, 2).astype(BF16),
                  ((0, 0), (0, 0), (0, Fp - F)))                     # [H,N,Fp]
    bias3 = jnp.pad(gp["bias"].reshape(H, 1, F).astype(F32),
                    ((0, 0), (0, 0), (0, Fp - F)))                   # [H,1,Fp]
    mask_b = mask.astype(BF16)                                       # [N,N]
    alphas = jnp.stack([jnp.asarray(gp["act_prelu"], F32),
                        jnp.asarray(gp["ga_prelu"], F32)]).reshape(2)
    inv_heads = 1.0 / H

    def kernel(wh_ref, el_ref, er_ref, mask_ref, bias_ref, alpha_ref,
               o_ref, acc_ref):
        h = pl.program_id(1)

        @pl.when(h == 0)
        def _():
            acc_ref[...] = jnp.zeros_like(acc_ref)

        m = mask_ref[...] > 0.0
        e = er_ref[0] + el_ref[0]                       # [tm,1]+[1,N]->[tm,N]
        e = jnp.where(e >= 0.0, e, 0.2 * e)             # LeakyReLU(0.2)
        e = jnp.where(m, e, -1e30)
        emax = jnp.max(e, axis=-1, keepdims=True)
        p = jnp.where(m, jnp.exp(e - emax), 0.0)
        denom = jnp.sum(p, axis=-1, keepdims=True)
        inv = jnp.where(denom > 0.0,
                        pl.reciprocal(jnp.maximum(denom, 1e-20), approx=True),
                        0.0)
        att = (p * inv).astype(jnp.bfloat16)            # bf16 MXU operand
        rst = jnp.dot(att, wh_ref[0], preferred_element_type=jnp.float32)
        rst = rst + bias_ref[0]
        act_a = alpha_ref[0]
        rst = jnp.where(rst >= 0.0, rst, act_a * rst)   # GATConv activation
        acc_ref[...] += rst

        @pl.when(h == pl.num_programs(1) - 1)
        def _():
            ga_a = alpha_ref[1]
            y = acc_ref[...] * inv_heads                # head mean
            o_ref[...] = jnp.where(y >= 0.0, y, ga_a * y)  # outer PReLU

    out = pl.pallas_call(
        kernel,
        out_shape=jax.ShapeDtypeStruct((N, Fp), F32),
        grid=(N // tm, H),
        in_specs=[
            pl.BlockSpec((1, N, Fp), lambda i, h: (h, 0, 0)),
            pl.BlockSpec((1, 1, N), lambda i, h: (h, 0, 0)),
            pl.BlockSpec((1, tm, 1), lambda i, h: (h, i, 0)),
            pl.BlockSpec((tm, N), lambda i, h: (i, 0)),
            pl.BlockSpec((1, 1, Fp), lambda i, h: (h, 0, 0)),
            SMEM_SPEC,
        ],
        out_specs=pl.BlockSpec((tm, Fp), lambda i, h: (i, 0)),
        scratch_shapes=[pltpu.VMEM((tm, Fp), jnp.float32)],
        compiler_params=pltpu.CompilerParams(
            dimension_semantics=("parallel", "arbitrary")),
    )(wh3, el3, er3, mask_b, bias3, alphas)
    return out[:, :F]


# ----------------------------------------------------------------------------
# Kernel 4: SemanticAttention projection + tanh + score + per-layer node mean
#   (emits a small [1, L] result instead of a width-1 [N*L, 1] lane store)
# ----------------------------------------------------------------------------

def semantic_attention(z_list, z_stack, p):
    """z_list: L arrays [N, F]; z_stack: [N, L, F].  Returns [N, F]."""
    L = len(z_list)
    N, F = z_list[0].shape
    w1 = p["W1"].astype(BF16)                # [F, Fh]
    Fh = w1.shape[1]
    b1 = p["b1"].reshape(1, Fh).astype(F32)
    w2 = p["W2"].reshape(1, Fh).astype(F32)

    def kernel(*refs):
        z_refs = refs[:L]
        w1_ref, b1_ref, w2_ref, o_ref = refs[L:]
        row = jnp.zeros((1, L), jnp.float32)
        lane = lax.broadcasted_iota(jnp.int32, (1, L), 1)
        for l in range(L):
            h1 = jnp.tanh(jnp.dot(z_refs[l][...], w1_ref[...],
                                  preferred_element_type=jnp.float32)
                          + b1_ref[...])                       # [N, Fh]
            s = jnp.sum(h1 * w2_ref[...], axis=-1, keepdims=True)  # [N, 1]
            m = jnp.mean(s)                                    # scalar
            row = row + m * (lane == l).astype(jnp.float32)
        o_ref[...] = row

    w = pl.pallas_call(
        kernel,
        out_shape=jax.ShapeDtypeStruct((1, L), F32),
        grid=(1,),
        in_specs=([pl.BlockSpec((N, F), lambda i: (0, 0)) for _ in range(L)]
                  + [pl.BlockSpec((F, Fh), lambda i: (0, 0)),
                     pl.BlockSpec((1, Fh), lambda i: (0, 0)),
                     pl.BlockSpec((1, Fh), lambda i: (0, 0))]),
        out_specs=pl.BlockSpec((1, L), lambda i: (0, 0)),
    )(*[z.astype(BF16) for z in z_list], w1, b1, w2)

    # The 5-way softmax + weighted sum are genuinely tiny -> XLA.
    beta = jax.nn.softmax(w[0], axis=0)             # [L]
    return jnp.einsum("l,nlf->nf", beta, z_stack)   # [N, F]


# ----------------------------------------------------------------------------
# Kernel 5: InnerProductDecoder  drug @ W @ disease^T
#   (disease pre-transposed in the wrapper; parallel dst-row grid axis)
# ----------------------------------------------------------------------------

def _decoder_kernel(drug_ref, w_ref, disT_ref, o_ref):
    tmp = jnp.dot(drug_ref[...], w_ref[...], preferred_element_type=jnp.float32)
    o_ref[...] = jnp.dot(tmp.astype(jnp.bfloat16), disT_ref[...],
                         preferred_element_type=jnp.float32)


def inner_product_decoder(drug, disease, W):
    nR, F = drug.shape
    nD = disease.shape[0]
    tm = _row_tile(nR)
    # TODO(synk): also tile the nD (column) axis when the disease set is large.
    return pl.pallas_call(
        _decoder_kernel,
        out_shape=jax.ShapeDtypeStruct((nR, nD), F32),
        grid=(nR // tm,),
        in_specs=[
            pl.BlockSpec((tm, F), lambda i: (i, 0)),
            pl.BlockSpec((F, F), lambda i: (0, 0)),
            pl.BlockSpec((F, nD), lambda i: (0, 0)),
        ],
        out_specs=pl.BlockSpec((tm, nD), lambda i: (i, 0)),
        compiler_params=pltpu.CompilerParams(
            dimension_semantics=("parallel",)),
    )(drug.astype(BF16), W.astype(BF16), disease.T.astype(BF16))


# ----------------------------------------------------------------------------
# Model forward
# ----------------------------------------------------------------------------

def norm_adj(adj):
    """Fold GraphConv norm='both' into the adjacency: diag(c_dst) A diag(c_src)."""
    c_src = jnp.maximum(jnp.sum(adj, axis=0), 1.0) ** -0.5   # src out-degrees
    c_dst = jnp.maximum(jnp.sum(adj, axis=1), 1.0) ** -0.5   # dst in-degrees
    return c_dst[:, None] * adj * c_src[None, :]


def model_forward(params, adjs, x, mdrug, mdis, n_dis, n_drug, hidden, heads):
    n_nodes = {"drug": n_drug, "disease": n_dis}
    # degree normalisation + padding/stacking done once; reused by all layers
    adjn = {rel: norm_adj(adjs[rel]) for rel in ETYPES}
    stacks_full = build_group_stacks(adjn, ETYPES, n_nodes)
    stacks_sub = build_group_stacks(adjn, SUBNET_RELS, n_nodes)

    ones = jnp.ones((hidden,), F32)
    zeros = jnp.zeros((hidden,), F32)

    drug_list = [mdrug]
    dis_list = [mdis]

    # input linears (bias folded into the matmul epilogue, identity activation)
    h = {
        "disease": fused_matmul(x["disease"], params["disease_linear"]["W"],
                                shift=params["disease_linear"]["b"]),
        "drug": fused_matmul(x["drug"], params["drug_linear"]["W"],
                             shift=params["drug_linear"]["b"]),
    }
    drug_list.append(h["drug"])
    dis_list.append(h["disease"])

    # HeteroGCN layers 1 & 2 (bn=True, dp=True; eval dropout == identity)
    for name in ("gcn1", "gcn2"):
        lp = params[name]
        h = hetero_gcn_layer(stacks_full, h, lp["rels"],
                             lp["bn_scale"], lp["bn_shift"], lp["prelu"],
                             n_nodes, hidden)
    drug_list.append(h["drug"])
    dis_list.append(h["disease"])

    # SubnetworkEncoder: drug/disease sub-relations, bn=False, dp=True
    sp = params["subnet"]
    h = hetero_gcn_layer(stacks_sub,
                         {"drug": h["drug"], "disease": h["disease"]},
                         sp["rels"], ones, zeros, sp["prelu"],
                         n_nodes, hidden)
    drug_list.append(h["drug"])
    dis_list.append(h["disease"])

    # Graph_attention: GATConv on the homogeneous graph (disease nodes first)
    gp = params["gat"]
    new_h = jnp.concatenate([h["disease"], h["drug"]], axis=0)   # [N, hidden]
    feat = fused_matmul(new_h, gp["fc_W"])                       # [N, H*F]
    rst = gat_attention(feat, gp, adjs["homog_mask"], heads, hidden)
    h["disease"] = rst[:n_dis]
    h["drug"] = rst[n_dis:n_dis + n_drug]
    drug_list.append(h["drug"])
    dis_list.append(h["disease"])

    # layer attention over the 5 stacked embeddings
    z_drug = jnp.stack(drug_list, axis=1)      # [n_drug, 5, hidden]
    z_dis = jnp.stack(dis_list, axis=1)        # [n_dis , 5, hidden]
    h_drug = semantic_attention(drug_list, z_drug, params["att_drug"])
    h_dis = semantic_attention(dis_list, z_dis, params["att_dis"])

    # InnerProductDecoder (dropout == identity in eval)
    return inner_product_decoder(h_drug, h_dis, params["decoder_W"])


# ----------------------------------------------------------------------------
# Deterministic parameter initialisation
# ----------------------------------------------------------------------------

def init_params(key, in_feats, hidden, heads):
    kcount = [0]

    def nk():
        kcount[0] += 1
        return jax.random.fold_in(key, kcount[0])

    def w(shape, scale=None):
        if scale is None:
            scale = 1.0 / float(jnp.sqrt(jnp.asarray(shape[0], F32)))
        return jax.random.normal(nk(), shape, F32) * scale

    eps = 1e-5
    params = {}
    params["drug_linear"] = {"W": w((in_feats, hidden)), "b": w((hidden,), 0.01)}
    params["disease_linear"] = {"W": w((in_feats, hidden)), "b": w((hidden,), 0.01)}

    def gcn_layer(rel_list):
        gamma = 1.0 + 0.1 * jax.random.normal(nk(), (hidden,), F32)
        beta = 0.1 * jax.random.normal(nk(), (hidden,), F32)
        return {
            "rels": {r: {"W": w((hidden, hidden)), "b": jnp.zeros((hidden,), F32)}
                     for r in rel_list},
            # eval-mode BatchNorm1d with running_mean=0, running_var=1
            "bn_scale": gamma / jnp.sqrt(1.0 + eps),
            "bn_shift": beta,
            "prelu": jnp.asarray(0.25, F32),
        }

    params["gcn1"] = gcn_layer(ETYPES)
    params["gcn2"] = gcn_layer(ETYPES)
    params["subnet"] = gcn_layer(SUBNET_RELS)

    params["gat"] = {
        "fc_W": w((hidden, heads * hidden)),
        "attn_l": w((heads, hidden), 0.1),
        "attn_r": w((heads, hidden), 0.1),
        "bias": jnp.zeros((heads * hidden,), F32),
        "act_prelu": jnp.asarray(0.25, F32),   # GATConv activation PReLU
        "ga_prelu": jnp.asarray(0.25, F32),    # Graph_attention.prelu
    }

    def sem_att():
        return {"W1": w((hidden, 128)), "b1": w((128,), 0.01), "W2": w((128, 1))}

    params["att_drug"] = sem_att()
    params["att_dis"] = sem_att()
    params["decoder_W"] = w((hidden, hidden))
    return params


# ----------------------------------------------------------------------------
# Driver
# ----------------------------------------------------------------------------

if __name__ == "__main__":
    key = jax.random.PRNGKey(0)
    n_dis, n_drug = 8, 8
    in_feats, hidden, heads = 48, 32, 4

    # deterministic dense adjacencies A[dst, src]
    def rand_adj(k, nd, ns, sym=False):
        a = (jax.random.uniform(k, (nd, ns)) < 0.4).astype(F32)
        if sym:
            a = jnp.maximum(a, a.T)
            a = jnp.maximum(a, jnp.eye(nd, dtype=F32))  # self loops
        return a

    k_dd, k_dis, k_cross, kxd, kxs, kmd, kms = jax.random.split(key, 7)
    adj_drug_drug = rand_adj(k_dd, n_drug, n_drug, sym=True)
    adj_dis_dis = rand_adj(k_dis, n_dis, n_dis, sym=True)
    adj_drug_disease = rand_adj(k_cross, n_dis, n_drug)      # src drug -> dst disease
    adj_disease_drug = adj_drug_disease.T                    # reverse relation

    adjs = {
        "drug_drug": adj_drug_drug,
        "disease_disease": adj_dis_dis,
        "drug_disease": adj_drug_disease,
        "disease_drug": adj_disease_drug,
    }
    # homogeneous graph: disease nodes [0, n_dis), drug nodes [n_dis, n_dis+n_drug)
    adjs["homog_mask"] = jnp.block(
        [[adj_dis_dis, adj_drug_disease],
         [adj_disease_drug, adj_drug_drug]]
    )

    x = {
        "drug": jax.random.normal(kxd, (n_drug, in_feats), F32),
        "disease": jax.random.normal(kxs, (n_dis, in_feats), F32),
    }
    mdrug = jax.random.normal(kmd, (n_drug, hidden), F32)
    mdis = jax.random.normal(kms, (n_dis, hidden), F32)

    params = init_params(jax.random.PRNGKey(42), in_feats, hidden, heads)

    fwd = jax.jit(functools.partial(model_forward, n_dis=n_dis, n_drug=n_drug,
                                    hidden=hidden, heads=heads))
    out = fwd(params, adjs, x, mdrug, mdis)
    out = jax.block_until_ready(out)

    assert out.shape == (n_drug, n_dis), out.shape
    assert bool(jnp.all(jnp.isfinite(out)))
    print("KERNEL_OK")
</pallas_src>

<mosaic_0001>
module attributes {stable_mosaic.version = 11 : i64} {
  func.func @_matmul_epilogue_kernel(%arg0: i32, %arg1: i32, %arg2: i32, %arg3: memref<8x128xbf16, #tpu.memory_space<vmem>>, %arg4: memref<128x128xbf16, #tpu.memory_space<vmem>>, %arg5: memref<1x128xf32, #tpu.memory_space<vmem>>, %arg6: memref<1x128xf32, #tpu.memory_space<vmem>>, %arg7: memref<1xf32, #tpu.memory_space<smem>>, %arg8: memref<8x128xf32, #tpu.memory_space<vmem>>, %arg9: memref<8x128xf32, #tpu.memory_space<vmem>>) attributes {dimension_semantics = [#tpu.dimension_semantics<parallel>, #tpu.dimension_semantics<parallel>, #tpu.dimension_semantics<arbitrary>], iteration_bounds = array<i64: 1, 1, 1>, scalar_prefetch = 0 : i64, scratch_operands = 1 : i64, tpu.core_type = #tpu.core_type<tc>, window_params = [{transform_indices = @transform_0, window_bounds = array<i64: 8, 128>}, {transform_indices = @transform_1, window_bounds = array<i64: 128, 128>}, {transform_indices = @transform_2, window_bounds = array<i64: 1, 128>}, {transform_indices = @transform_3, window_bounds = array<i64: 1, 128>}, {transform_indices = @transform_4, window_bounds = array<i64: 1>}, {transform_indices = @transform_5, window_bounds = array<i64: 8, 128>}]} {
    %c0_i32 = arith.constant 0 : i32
    %0 = arith.cmpi eq, %arg2, %c0_i32 : i32
    %1 = arith.extui %0 : i1 to i32
    %c0_i32_0 = arith.constant 0 : i32
    %2 = arith.cmpi ne, %1, %c0_i32_0 : i32
    scf.if %2 {
      %cst_10 = arith.constant 0.000000e+00 : f32
      %12 = vector.broadcast %cst_10 : f32 to vector<8x128xf32>
      %c0_11 = arith.constant 0 : index
      %c0_12 = arith.constant 0 : index
      %13 = vector.load %arg9[%c0_11, %c0_12] : memref<8x128xf32, #tpu.memory_space<vmem>>, vector<8x128xf32>
      tpu.vector_store %arg9[%c0_11, %c0_12], %12 {strides = array<i32>} : memref<8x128xf32, #tpu.memory_space<vmem>>, vector<8x128xf32>,
    } else {
    }
    %c0 = arith.constant 0 : index
    %c0_1 = arith.constant 0 : index
    %3 = vector.load %arg9[%c0, %c0_1] : memref<8x128xf32, #tpu.memory_space<vmem>>, vector<8x128xf32>
    %c0_2 = arith.constant 0 : index
    %c0_3 = arith.constant 0 : index
    %4 = vector.load %arg3[%c0_2, %c0_3] : memref<8x128xbf16, #tpu.memory_space<vmem>>, vector<8x128xbf16>
    %c0_4 = arith.constant 0 : index
    %c0_5 = arith.constant 0 : index
    %5 = vector.load %arg4[%c0_4, %c0_5] : memref<128x128xbf16, #tpu.memory_space<vmem>>, vector<128x128xbf16>
    %cst = arith.constant dense<0.000000e+00> : vector<8x128xf32>
    %6 = tpu.matmul %4, %5, %cst {dimension_numbers = #tpu.dot_dimension_numbers<[1], [0], [0], [1], [0, 0, 1, 1], [], []>} : vector<8x128xbf16>, vector<128x128xbf16>, vector<8x128xf32> -> vector<8x128xf32>
    %7 = arith.addf %3, %6 : vector<8x128xf32>
    %c0_6 = arith.constant 0 : index
    %c0_7 = arith.constant 0 : index
    %8 = vector.load %arg9[%c0_6, %c0_7] : memref<8x128xf32, #tpu.memory_space<vmem>>, vector<8x128xf32>
    tpu.vector_store %arg9[%c0_6, %c0_7], %7 {strides = array<i32>} : memref<8x128xf32, #tpu.memory_space<vmem>>, vector<8x128xf32>,
    %c0_i32_8 = arith.constant 0 : i32
    %9 = arith.cmpi eq, %arg2, %c0_i32_8 : i32
    %10 = arith.extui %9 : i1 to i32
    %c0_i32_9 = arith.constant 0 : i32
    %11 = arith.cmpi ne, %10, %c0_i32_9 : i32
    scf.if %11 {
      %c0_10 = arith.constant 0 : index
      %c0_11 = arith.constant 0 : index
      %12 = vector.load %arg9[%c0_10, %c0_11] : memref<8x128xf32, #tpu.memory_space<vmem>>, vector<8x128xf32>
      %c0_12 = arith.constant 0 : index
      %c0_13 = arith.constant 0 : index
      %13 = vector.load %arg5[%c0_12, %c0_13] : memref<1x128xf32, #tpu.memory_space<vmem>>, vector<1x128xf32>
      %14 = vector.broadcast %13 : vector<1x128xf32> to vector<8x128xf32>
      %15 = arith.mulf %12, %14 : vector<8x128xf32>
      %c0_14 = arith.constant 0 : index
      %c0_15 = arith.constant 0 : index
      %16 = vector.load %arg6[%c0_14, %c0_15] : memref<1x128xf32, #tpu.memory_space<vmem>>, vector<1x128xf32>
      %17 = vector.broadcast %16 : vector<1x128xf32> to vector<8x128xf32>
      %18 = arith.addf %15, %17 : vector<8x128xf32>
      %c0_16 = arith.constant 0 : index
      %19 = memref.load %arg7[%c0_16] : memref<1xf32, #tpu.memory_space<smem>>
      %cst_17 = arith.constant 0.000000e+00 : f32
      %20 = vector.broadcast %cst_17 : f32 to vector<8x128xf32>
      %21 = arith.cmpf oge, %18, %20 : vector<8x128xf32>
      %22 = vector.broadcast %19 : f32 to vector<8x128xf32>
      %23 = arith.mulf %22, %18 : vector<8x128xf32>
      %24 = arith.select %21, %18, %23 : vector<8x128xi1>, vector<8x128xf32>
      %c0_18 = arith.constant 0 : index
      %c0_19 = arith.constant 0 : index
      %25 = vector.load %arg8[%c0_18, %c0_19] : memref<8x128xf32, #tpu.memory_space<vmem>>, vector<8x128xf32>
      tpu.vector_store %arg8[%c0_18, %c0_19], %24 {strides = array<i32>} : memref<8x128xf32, #tpu.memory_space<vmem>>, vector<8x128xf32>,
    } else {
    }
    return
  }
  func.func @transform_0(%arg0: i32, %arg1: i32, %arg2: i32) -> (i32, i32) {
    %c0_i32 = arith.constant 0 : i32
    return %arg0, %arg2 : i32, i32
  }
  func.func @transform_1(%arg0: i32, %arg1: i32, %arg2: i32) -> (i32, i32) {
    %c0_i32 = arith.constant 0 : i32
    return %arg2, %arg1 : i32, i32
  }
  func.func @transform_2(%arg0: i32, %arg1: i32, %arg2: i32) -> (i32, i32) {
    %c0_i32 = arith.constant 0 : i32
    %c0_i32_0 = arith.constant 0 : i32
    return %c0_i32, %arg1 : i32, i32
  }
  func.func @transform_3(%arg0: i32, %arg1: i32, %arg2: i32) -> (i32, i32) {
    %c0_i32 = arith.constant 0 : i32
    %c0_i32_0 = arith.constant 0 : i32
    return %c0_i32, %arg1 : i32, i32
  }
  func.func @transform_4(%arg0: i32, %arg1: i32, %arg2: i32) -> i32 {
    %c0_i32 = arith.constant 0 : i32
    %c0_i32_0 = arith.constant 0 : i32
    return %c0_i32 : i32
  }
  func.func @transform_5(%arg0: i32, %arg1: i32, %arg2: i32) -> (i32, i32) {
    %c0_i32 = arith.constant 0 : i32
    return %arg0, %arg1 : i32, i32
  }
}

module attributes {stable_mosaic.version = 11 : i64} {
  func.func @_hetero_gcn_kernel(%arg0: i32, %arg1: i32, %arg2: memref<1x8x8xbf16, #tpu.memory_space<vmem>>, %arg3: memref<1x8x128xbf16, #tpu.memory_space<vmem>>, %arg4: memref<1x128x128xbf16, #tpu.memory_space<vmem>>, %arg5: memref<1x1x128xf32, #tpu.memory_space<vmem>>, %arg6: memref<1x128xf32, #tpu.memory_space<vmem>>, %arg7: memref<1x128xf32, #tpu.memory_space<vmem>>, %arg8: memref<1xf32, #tpu.memory_space<smem>>, %arg9: memref<8x128xf32, #tpu.memory_space<vmem>>, %arg10: memref<8x128xf32, #tpu.memory_space<vmem>>) attributes {dimension_semantics = [#tpu.dimension_semantics<parallel>, #tpu.dimension_semantics<arbitrary>], iteration_bounds = array<i64: 1, 2>, scalar_prefetch = 0 : i64, scratch_operands = 1 : i64, tpu.core_type = #tpu.core_type<tc>, window_params = [{transform_indices = @transform_0, window_bounds = array<i64: 1, 8, 8>}, {transform_indices = @transform_1, window_bounds = array<i64: 1, 8, 128>}, {transform_indices = @transform_2, window_bounds = array<i64: 1, 128, 128>}, {transform_indices = @transform_3, window_bounds = array<i64: 1, 1, 128>}, {pipeline_mode = #tpu.pipeline_mode<synchronous>, transform_indices = @transform_4, window_bounds = array<i64: 1, 128>}, {pipeline_mode = #tpu.pipeline_mode<synchronous>, transform_indices = @transform_5, window_bounds = array<i64: 1, 128>}, {transform_indices = @transform_6, window_bounds = array<i64: 1>}, {transform_indices = @transform_7, window_bounds = array<i64: 8, 128>}]} {
    %c0_i32 = arith.constant 0 : i32
    %0 = arith.cmpi eq, %arg1, %c0_i32 : i32
    %1 = arith.extui %0 : i1 to i32
    %c0_i32_0 = arith.constant 0 : i32
    %2 = arith.cmpi ne, %1, %c0_i32_0 : i32
    scf.if %2 {
      %cst_18 = arith.constant 0.000000e+00 : f32
      %22 = vector.broadcast %cst_18 : f32 to vector<8x128xf32>
      %c0_19 = arith.constant 0 : index
      %c0_20 = arith.constant 0 : index
      %23 = vector.load %arg10[%c0_19, %c0_20] : memref<8x128xf32, #tpu.memory_space<vmem>>, vector<8x128xf32>
      tpu.vector_store %arg10[%c0_19, %c0_20], %22 {strides = array<i32>} : memref<8x128xf32, #tpu.memory_space<vmem>>, vector<8x128xf32>,
    } else {
    }
    %c0 = arith.constant 0 : index
    %c0_1 = arith.constant 0 : index
    %c0_2 = arith.constant 0 : index
    %3 = vector.load %arg3[%c0, %c0_1, %c0_2] : memref<1x8x128xbf16, #tpu.memory_space<vmem>>, vector<1x8x128xbf16>
    %4 = vector.shape_cast %3 : vector<1x8x128xbf16> to vector<8x128xbf16>
    %c0_3 = arith.constant 0 : index
    %c0_4 = arith.constant 0 : index
    %c0_5 = arith.constant 0 : index
    %5 = vector.load %arg4[%c0_3, %c0_4, %c0_5] : memref<1x128x128xbf16, #tpu.memory_space<vmem>>, vector<1x128x128xbf16>
    %6 = vector.shape_cast %5 : vector<1x128x128xbf16> to vector<128x128xbf16>
    %cst = arith.constant dense<0.000000e+00> : vector<8x128xf32>
    %7 = tpu.matmul %4, %6, %cst {dimension_numbers = #tpu.dot_dimension_numbers<[1], [0], [0], [1], [0, 0, 1, 1], [], []>} : vector<8x128xbf16>, vector<128x128xbf16>, vector<8x128xf32> -> vector<8x128xf32>
    %c0_6 = arith.constant 0 : index
    %c0_7 = arith.constant 0 : index
    %8 = vector.load %arg10[%c0_6, %c0_7] : memref<8x128xf32, #tpu.memory_space<vmem>>, vector<8x128xf32>
    %c0_8 = arith.constant 0 : index
    %c0_9 = arith.constant 0 : index
    %c0_10 = arith.constant 0 : index
    %9 = vector.load %arg2[%c0_8, %c0_9, %c0_10] : memref<1x8x8xbf16, #tpu.memory_space<vmem>>, vector<1x8x8xbf16>
    %10 = vector.shape_cast %9 : vector<1x8x8xbf16> to vector<8x8xbf16>
    %11 = arith.truncf %7 : vector<8x128xf32> to vector<8x128xbf16>
    %cst_11 = arith.constant dense<0.000000e+00> : vector<8x128xf32>
    %12 = tpu.matmul %10, %11, %cst_11 {dimension_numbers = #tpu.dot_dimension_numbers<[1], [0], [0], [1], [0, 0, 1, 1], [], []>} : vector<8x8xbf16>, vector<8x128xbf16>, vector<8x128xf32> -> vector<8x128xf32>
    %c0_12 = arith.constant 0 : index
    %c0_13 = arith.constant 0 : index
    %c0_14 = arith.constant 0 : index
    %13 = vector.load %arg5[%c0_12, %c0_13, %c0_14] : memref<1x1x128xf32, #tpu.memory_space<vmem>>, vector<1x1x128xf32>
    %14 = vector.shape_cast %13 : vector<1x1x128xf32> to vector<1x128xf32>
    %15 = vector.broadcast %14 : vector<1x128xf32> to vector<8x128xf32>
    %16 = arith.addf %12, %15 : vector<8x128xf32>
    %17 = arith.addf %8, %16 : vector<8x128xf32>
    %c0_15 = arith.constant 0 : index
    %c0_16 = arith.constant 0 : index
    %18 = vector.load %arg10[%c0_15, %c0_16] : memref<8x128xf32, #tpu.memory_space<vmem>>, vector<8x128xf32>
    tpu.vector_store %arg10[%c0_15, %c0_16], %17 {strides = array<i32>} : memref<8x128xf32, #tpu.memory_space<vmem>>, vector<8x128xf32>,
    %c1_i32 = arith.constant 1 : i32
    %19 = arith.cmpi eq, %arg1, %c1_i32 : i32
    %20 = arith.extui %19 : i1 to i32
    %c0_i32_17 = arith.constant 0 : i32
    %21 = arith.cmpi ne, %20, %c0_i32_17 : i32
    scf.if %21 {
      %c0_18 = arith.constant 0 : index
      %c0_19 = arith.constant 0 : index
      %22 = vector.load %arg10[%c0_18, %c0_19] : memref<8x128xf32, #tpu.memory_space<vmem>>, vector<8x128xf32>
      %c0_20 = arith.constant 0 : index
      %c0_21 = arith.constant 0 : index
      %23 = vector.load %arg6[%c0_20, %c0_21] : memref<1x128xf32, #tpu.memory_space<vmem>>, vector<1x128xf32>
      %24 = vector.broadcast %23 : vector<1x128xf32> to vector<8x128xf32>
      %25 = arith.mulf %22, %24 : vector<8x128xf32>
      %c0_22 = arith.constant 0 : index
      %c0_23 = arith.constant 0 : index
      %26 = vector.load %arg7[%c0_22, %c0_23] : memref<1x128xf32, #tpu.memory_space<vmem>>, vector<1x128xf32>
      %27 = vector.broadcast %26 : vector<1x128xf32> to vector<8x128xf32>
      %28 = arith.addf %25, %27 : vector<8x128xf32>
      %c0_24 = arith.constant 0 : index
      %29 = memref.load %arg8[%c0_24] : memref<1xf32, #tpu.memory_space<smem>>
      %cst_25 = arith.constant 0.000000e+00 : f32
      %30 = vector.broadcast %cst_25 : f32 to vector<8x128xf32>
      %31 = arith.cmpf oge, %28, %30 : vector<8x128xf32>
      %32 = vector.broadcast %29 : f32 to vector<8x128xf32>
      %33 = arith.mulf %32, %28 : vector<8x128xf32>
      %34 = arith.select %31, %28, %33 : vector<8x128xi1>, vector<8x128xf32>
      %c0_26 = arith.constant 0 : index
      %c0_27 = arith.constant 0 : index
      %35 = vector.load %arg9[%c0_26, %c0_27] : memref<8x128xf32, #tpu.memory_space<vmem>>, vector<8x128xf32>
      tpu.vector_store %arg9[%c0_26, %c0_27], %34 {strides = array<i32>} : memref<8x128xf32, #tpu.memory_space<vmem>>, vector<8x128xf32>,
    } else {
    }
    return
  }
  func.func @transform_0(%arg0: i32, %arg1: i32) -> (i32, i32, i32) {
    %c0_i32 = arith.constant 0 : i32
    %c0_i32_0 = arith.constant 0 : i32
    return %arg1, %arg0, %c0_i32 : i32, i32, i32
  }
  func.func @transform_1(%arg0: i32, %arg1: i32) -> (i32, i32, i32) {
    %c0_i32 = arith.constant 0 : i32
    %c0_i32_0 = arith.constant 0 : i32
    %c0_i32_1 = arith.constant 0 : i32
    return %arg1, %c0_i32, %c0_i32_0 : i32, i32, i32
  }
  func.func @transform_2(%arg0: i32, %arg1: i32) -> (i32, i32, i32) {
    %c0_i32 = arith.constant 0 : i32
    %c0_i32_0 = arith.constant 0 : i32
    %c0_i32_1 = arith.constant 0 : i32
    return %arg1, %c0_i32, %c0_i32_0 : i32, i32, i32
  }
  func.func @transform_3(%arg0: i32, %arg1: i32) -> (i32, i32, i32) {
    %c0_i32 = arith.constant 0 : i32
    %c0_i32_0 = arith.constant 0 : i32
    %c0_i32_1 = arith.constant 0 : i32
    return %arg1, %c0_i32, %c0_i32_0 : i32, i32, i32
  }
  func.func @transform_4(%arg0: i32, %arg1: i32) -> (i32, i32) {
    %c0_i32 = arith.constant 0 : i32
    %c0_i32_0 = arith.constant 0 : i32
    %c0_i32_1 = arith.constant 0 : i32
    return %c0_i32, %c0_i32_0 : i32, i32
  }
  func.func @transform_5(%arg0: i32, %arg1: i32) -> (i32, i32) {
    %c0_i32 = arith.constant 0 : i32
    %c0_i32_0 = arith.constant 0 : i32
    %c0_i32_1 = arith.constant 0 : i32
    return %c0_i32, %c0_i32_0 : i32, i32
  }
  func.func @transform_6(%arg0: i32, %arg1: i32) -> i32 {
    %c0_i32 = arith.constant 0 : i32
    %c0_i32_0 = arith.constant 0 : i32
    return %c0_i32 : i32
  }
  func.func @transform_7(%arg0: i32, %arg1: i32) -> (i32, i32) {
    %c0_i32 = arith.constant 0 : i32
    %c0_i32_0 = arith.constant 0 : i32
    return %arg0, %c0_i32 : i32, i32
  }
}

module attributes {stable_mosaic.version = 11 : i64} {
  func.func @_matmul_epilogue_kernel(%arg0: i32, %arg1: i32, %arg2: i32, %arg3: memref<16x128xbf16, #tpu.memory_space<vmem>>, %arg4: memref<128x128xbf16, #tpu.memory_space<vmem>>, %arg5: memref<1x128xf32, #tpu.memory_space<vmem>>, %arg6: memref<1x128xf32, #tpu.memory_space<vmem>>, %arg7: memref<1xf32, #tpu.memory_space<smem>>, %arg8: memref<16x128xf32, #tpu.memory_space<vmem>>, %arg9: memref<16x128xf32, #tpu.memory_space<vmem>>) attributes {dimension_semantics = [#tpu.dimension_semantics<parallel>, #tpu.dimension_semantics<parallel>, #tpu.dimension_semantics<arbitrary>], iteration_bounds = array<i64: 1, 1, 1>, scalar_prefetch = 0 : i64, scratch_operands = 1 : i64, tpu.core_type = #tpu.core_type<tc>, window_params = [{transform_indices = @transform_0, window_bounds = array<i64: 16, 128>}, {transform_indices = @transform_1, window_bounds = array<i64: 128, 128>}, {transform_indices = @transform_2, window_bounds = array<i64: 1, 128>}, {transform_indices = @transform_3, window_bounds = array<i64: 1, 128>}, {transform_indices = @transform_4, window_bounds = array<i64: 1>}, {transform_indices = @transform_5, window_bounds = array<i64: 16, 128>}]} {
    %c0_i32 = arith.constant 0 : i32
    %0 = arith.cmpi eq, %arg2, %c0_i32 : i32
    %1 = arith.extui %0 : i1 to i32
    %c0_i32_0 = arith.constant 0 : i32
    %2 = arith.cmpi ne, %1, %c0_i32_0 : i32
    scf.if %2 {
      %cst_10 = arith.constant 0.000000e+00 : f32
      %12 = vector.broadcast %cst_10 : f32 to vector<16x128xf32>
      %c0_11 = arith.constant 0 : index
      %c0_12 = arith.constant 0 : index
      %13 = vector.load %arg9[%c0_11, %c0_12] : memref<16x128xf32, #tpu.memory_space<vmem>>, vector<16x128xf32>
      tpu.vector_store %arg9[%c0_11, %c0_12], %12 {strides = array<i32>} : memref<16x128xf32, #tpu.memory_space<vmem>>, vector<16x128xf32>,
    } else {
    }
    %c0 = arith.constant 0 : index
    %c0_1 = arith.constant 0 : index
    %3 = vector.load %arg9[%c0, %c0_1] : memref<16x128xf32, #tpu.memory_space<vmem>>, vector<16x128xf32>
    %c0_2 = arith.constant 0 : index
    %c0_3 = arith.constant 0 : index
    %4 = vector.load %arg3[%c0_2, %c0_3] : memref<16x128xbf16, #tpu.memory_space<vmem>>, vector<16x128xbf16>
    %c0_4 = arith.constant 0 : index
    %c0_5 = arith.constant 0 : index
    %5 = vector.load %arg4[%c0_4, %c0_5] : memref<128x128xbf16, #tpu.memory_space<vmem>>, vector<128x128xbf16>
    %cst = arith.constant dense<0.000000e+00> : vector<16x128xf32>
    %6 = tpu.matmul %4, %5, %cst {dimension_numbers = #tpu.dot_dimension_numbers<[1], [0], [0], [1], [0, 0, 1, 1], [], []>} : vector<16x128xbf16>, vector<128x128xbf16>, vector<16x128xf32> -> vector<16x128xf32>
    %7 = arith.addf %3, %6 : vector<16x128xf32>
    %c0_6 = arith.constant 0 : index
    %c0_7 = arith.constant 0 : index
    %8 = vector.load %arg9[%c0_6, %c0_7] : memref<16x128xf32, #tpu.memory_space<vmem>>, vector<16x128xf32>
    tpu.vector_store %arg9[%c0_6, %c0_7], %7 {strides = array<i32>} : memref<16x128xf32, #tpu.memory_space<vmem>>, vector<16x128xf32>,
    %c0_i32_8 = arith.constant 0 : i32
    %9 = arith.cmpi eq, %arg2, %c0_i32_8 : i32
    %10 = arith.extui %9 : i1 to i32
    %c0_i32_9 = arith.constant 0 : i32
    %11 = arith.cmpi ne, %10, %c0_i32_9 : i32
    scf.if %11 {
      %c0_10 = arith.constant 0 : index
      %c0_11 = arith.constant 0 : index
      %12 = vector.load %arg9[%c0_10, %c0_11] : memref<16x128xf32, #tpu.memory_space<vmem>>, vector<16x128xf32>
      %c0_12 = arith.constant 0 : index
      %c0_13 = arith.constant 0 : index
      %13 = vector.load %arg5[%c0_12, %c0_13] : memref<1x128xf32, #tpu.memory_space<vmem>>, vector<1x128xf32>
      %14 = vector.broadcast %13 : vector<1x128xf32> to vector<16x128xf32>
      %15 = arith.mulf %12, %14 : vector<16x128xf32>
      %c0_14 = arith.constant 0 : index
      %c0_15 = arith.constant 0 : index
      %16 = vector.load %arg6[%c0_14, %c0_15] : memref<1x128xf32, #tpu.memory_space<vmem>>, vector<1x128xf32>
      %17 = vector.broadcast %16 : vector<1x128xf32> to vector<16x128xf32>
      %18 = arith.addf %15, %17 : vector<16x128xf32>
      %c0_16 = arith.constant 0 : index
      %19 = memref.load %arg7[%c0_16] : memref<1xf32, #tpu.memory_space<smem>>
      %cst_17 = arith.constant 0.000000e+00 : f32
      %20 = vector.broadcast %cst_17 : f32 to vector<16x128xf32>
      %21 = arith.cmpf oge, %18, %20 : vector<16x128xf32>
      %22 = vector.broadcast %19 : f32 to vector<16x128xf32>
      %23 = arith.mulf %22, %18 : vector<16x128xf32>
      %24 = arith.select %21, %18, %23 : vector<16x128xi1>, vector<16x128xf32>
      %c0_18 = arith.constant 0 : index
      %c0_19 = arith.constant 0 : index
      %25 = vector.load %arg8[%c0_18, %c0_19] : memref<16x128xf32, #tpu.memory_space<vmem>>, vector<16x128xf32>
      tpu.vector_store %arg8[%c0_18, %c0_19], %24 {strides = array<i32>} : memref<16x128xf32, #tpu.memory_space<vmem>>, vector<16x128xf32>,
    } else {
    }
    return
  }
  func.func @transform_0(%arg0: i32, %arg1: i32, %arg2: i32) -> (i32, i32) {
    %c0_i32 = arith.constant 0 : i32
    return %arg0, %arg2 : i32, i32
  }
  func.func @transform_1(%arg0: i32, %arg1: i32, %arg2: i32) -> (i32, i32) {
    %c0_i32 = arith.constant 0 : i32
    return %arg2, %arg1 : i32, i32
  }
  func.func @transform_2(%arg0: i32, %arg1: i32, %arg2: i32) -> (i32, i32) {
    %c0_i32 = arith.constant 0 : i32
    %c0_i32_0 = arith.constant 0 : i32
    return %c0_i32, %arg1 : i32, i32
  }
  func.func @transform_3(%arg0: i32, %arg1: i32, %arg2: i32) -> (i32, i32) {
    %c0_i32 = arith.constant 0 : i32
    %c0_i32_0 = arith.constant 0 : i32
    return %c0_i32, %arg1 : i32, i32
  }
  func.func @transform_4(%arg0: i32, %arg1: i32, %arg2: i32) -> i32 {
    %c0_i32 = arith.constant 0 : i32
    %c0_i32_0 = arith.constant 0 : i32
    return %c0_i32 : i32
  }
  func.func @transform_5(%arg0: i32, %arg1: i32, %arg2: i32) -> (i32, i32) {
    %c0_i32 = arith.constant 0 : i32
    return %arg0, %arg1 : i32, i32
  }
}

module attributes {stable_mosaic.version = 11 : i64} {
  func.func @_hetero_gcn_kernel(%arg0: i32, %arg1: i32, %arg2: memref<1x8x8xbf16, #tpu.memory_space<vmem>>, %arg3: memref<1x8x128xbf16, #tpu.memory_space<vmem>>, %arg4: memref<1x128x128xbf16, #tpu.memory_space<vmem>>, %arg5: memref<1x1x128xf32, #tpu.memory_space<vmem>>, %arg6: memref<1x128xf32, #tpu.memory_space<vmem>>, %arg7: memref<1x128xf32, #tpu.memory_space<vmem>>, %arg8: memref<1xf32, #tpu.memory_space<smem>>, %arg9: memref<8x128xf32, #tpu.memory_space<vmem>>, %arg10: memref<8x128xf32, #tpu.memory_space<vmem>>) attributes {dimension_semantics = [#tpu.dimension_semantics<parallel>, #tpu.dimension_semantics<arbitrary>], iteration_bounds = array<i64: 1, 1>, scalar_prefetch = 0 : i64, scratch_operands = 1 : i64, tpu.core_type = #tpu.core_type<tc>, window_params = [{transform_indices = @transform_0, window_bounds = array<i64: 1, 8, 8>}, {transform_indices = @transform_1, window_bounds = array<i64: 1, 8, 128>}, {transform_indices = @transform_2, window_bounds = array<i64: 1, 128, 128>}, {transform_indices = @transform_3, window_bounds = array<i64: 1, 1, 128>}, {pipeline_mode = #tpu.pipeline_mode<synchronous>, transform_indices = @transform_4, window_bounds = array<i64: 1, 128>}, {pipeline_mode = #tpu.pipeline_mode<synchronous>, transform_indices = @transform_5, window_bounds = array<i64: 1, 128>}, {transform_indices = @transform_6, window_bounds = array<i64: 1>}, {transform_indices = @transform_7, window_bounds = array<i64: 8, 128>}]} {
    %c0_i32 = arith.constant 0 : i32
    %0 = arith.cmpi eq, %arg1, %c0_i32 : i32
    %1 = arith.extui %0 : i1 to i32
    %c0_i32_0 = arith.constant 0 : i32
    %2 = arith.cmpi ne, %1, %c0_i32_0 : i32
    scf.if %2 {
      %cst_19 = arith.constant 0.000000e+00 : f32
      %22 = vector.broadcast %cst_19 : f32 to vector<8x128xf32>
      %c0_20 = arith.constant 0 : index
      %c0_21 = arith.constant 0 : index
      %23 = vector.load %arg10[%c0_20, %c0_21] : memref<8x128xf32, #tpu.memory_space<vmem>>, vector<8x128xf32>
      tpu.vector_store %arg10[%c0_20, %c0_21], %22 {strides = array<i32>} : memref<8x128xf32, #tpu.memory_space<vmem>>, vector<8x128xf32>,
    } else {
    }
    %c0 = arith.constant 0 : index
    %c0_1 = arith.constant 0 : index
    %c0_2 = arith.constant 0 : index
    %3 = vector.load %arg3[%c0, %c0_1, %c0_2] : memref<1x8x128xbf16, #tpu.memory_space<vmem>>, vector<1x8x128xbf16>
    %4 = vector.shape_cast %3 : vector<1x8x128xbf16> to vector<8x128xbf16>
    %c0_3 = arith.constant 0 : index
    %c0_4 = arith.constant 0 : index
    %c0_5 = arith.constant 0 : index
    %5 = vector.load %arg4[%c0_3, %c0_4, %c0_5] : memref<1x128x128xbf16, #tpu.memory_space<vmem>>, vector<1x128x128xbf16>
    %6 = vector.shape_cast %5 : vector<1x128x128xbf16> to vector<128x128xbf16>
    %cst = arith.constant dense<0.000000e+00> : vector<8x128xf32>
    %7 = tpu.matmul %4, %6, %cst {dimension_numbers = #tpu.dot_dimension_numbers<[1], [0], [0], [1], [0, 0, 1, 1], [], []>} : vector<8x128xbf16>, vector<128x128xbf16>, vector<8x128xf32> -> vector<8x128xf32>
    %c0_6 = arith.constant 0 : index
    %c0_7 = arith.constant 0 : index
    %8 = vector.load %arg10[%c0_6, %c0_7] : memref<8x128xf32, #tpu.memory_space<vmem>>, vector<8x128xf32>
    %c0_8 = arith.constant 0 : index
    %c0_9 = arith.constant 0 : index
    %c0_10 = arith.constant 0 : index
    %9 = vector.load %arg2[%c0_8, %c0_9, %c0_10] : memref<1x8x8xbf16, #tpu.memory_space<vmem>>, vector<1x8x8xbf16>
    %10 = vector.shape_cast %9 : vector<1x8x8xbf16> to vector<8x8xbf16>
    %11 = arith.truncf %7 : vector<8x128xf32> to vector<8x128xbf16>
    %cst_11 = arith.constant dense<0.000000e+00> : vector<8x128xf32>
    %12 = tpu.matmul %10, %11, %cst_11 {dimension_numbers = #tpu.dot_dimension_numbers<[1], [0], [0], [1], [0, 0, 1, 1], [], []>} : vector<8x8xbf16>, vector<8x128xbf16>, vector<8x128xf32> -> vector<8x128xf32>
    %c0_12 = arith.constant 0 : index
    %c0_13 = arith.constant 0 : index
    %c0_14 = arith.constant 0 : index
    %13 = vector.load %arg5[%c0_12, %c0_13, %c0_14] : memref<1x1x128xf32, #tpu.memory_space<vmem>>, vector<1x1x128xf32>
    %14 = vector.shape_cast %13 : vector<1x1x128xf32> to vector<1x128xf32>
    %15 = vector.broadcast %14 : vector<1x128xf32> to vector<8x128xf32>
    %16 = arith.addf %12, %15 : vector<8x128xf32>
    %17 = arith.addf %8, %16 : vector<8x128xf32>
    %c0_15 = arith.constant 0 : index
    %c0_16 = arith.constant 0 : index
    %18 = vector.load %arg10[%c0_15, %c0_16] : memref<8x128xf32, #tpu.memory_space<vmem>>, vector<8x128xf32>
    tpu.vector_store %arg10[%c0_15, %c0_16], %17 {strides = array<i32>} : memref<8x128xf32, #tpu.memory_space<vmem>>, vector<8x128xf32>,
    %c0_i32_17 = arith.constant 0 : i32
    %19 = arith.cmpi eq, %arg1, %c0_i32_17 : i32
    %20 = arith.extui %19 : i1 to i32
    %c0_i32_18 = arith.constant 0 : i32
    %21 = arith.cmpi ne, %20, %c0_i32_18 : i32
    scf.if %21 {
      %c0_19 = arith.constant 0 : index
      %c0_20 = arith.constant 0 : index
      %22 = vector.load %arg10[%c0_19, %c0_20] : memref<8x128xf32, #tpu.memory_space<vmem>>, vector<8x128xf32>
      %c0_21 = arith.constant 0 : index
      %c0_22 = arith.constant 0 : index
      %23 = vector.load %arg6[%c0_21, %c0_22] : memref<1x128xf32, #tpu.memory_space<vmem>>, vector<1x128xf32>
      %24 = vector.broadcast %23 : vector<1x128xf32> to vector<8x128xf32>
      %25 = arith.mulf %22, %24 : vector<8x128xf32>
      %c0_23 = arith.constant 0 : index
      %c0_24 = arith.constant 0 : index
      %26 = vector.load %arg7[%c0_23, %c0_24] : memref<1x128xf32, #tpu.memory_space<vmem>>, vector<1x128xf32>
      %27 = vector.broadcast %26 : vector<1x128xf32> to vector<8x128xf32>
      %28 = arith.addf %25, %27 : vector<8x128xf32>
      %c0_25 = arith.constant 0 : index
      %29 = memref.load %arg8[%c0_25] : memref<1xf32, #tpu.memory_space<smem>>
      %cst_26 = arith.constant 0.000000e+00 : f32
      %30 = vector.broadcast %cst_26 : f32 to vector<8x128xf32>
      %31 = arith.cmpf oge, %28, %30 : vector<8x128xf32>
      %32 = vector.broadcast %29 : f32 to vector<8x128xf32>
      %33 = arith.mulf %32, %28 : vector<8x128xf32>
      %34 = arith.select %31, %28, %33 : vector<8x128xi1>, vector<8x128xf32>
      %c0_27 = arith.constant 0 : index
      %c0_28 = arith.constant 0 : index
      %35 = vector.load %arg9[%c0_27, %c0_28] : memref<8x128xf32, #tpu.memory_space<vmem>>, vector<8x128xf32>
      tpu.vector_store %arg9[%c0_27, %c0_28], %34 {strides = array<i32>} : memref<8x128xf32, #tpu.memory_space<vmem>>, vector<8x128xf32>,
    } else {
    }
    return
  }
  func.func @transform_0(%arg0: i32, %arg1: i32) -> (i32, i32, i32) {
    %c0_i32 = arith.constant 0 : i32
    %c0_i32_0 = arith.constant 0 : i32
    return %arg1, %arg0, %c0_i32 : i32, i32, i32
  }
  func.func @transform_1(%arg0: i32, %arg1: i32) -> (i32, i32, i32) {
    %c0_i32 = arith.constant 0 : i32
    %c0_i32_0 = arith.constant 0 : i32
    %c0_i32_1 = arith.constant 0 : i32
    return %arg1, %c0_i32, %c0_i32_0 : i32, i32, i32
  }
  func.func @transform_2(%arg0: i32, %arg1: i32) -> (i32, i32, i32) {
    %c0_i32 = arith.constant 0 : i32
    %c0_i32_0 = arith.constant 0 : i32
    %c0_i32_1 = arith.constant 0 : i32
    return %arg1, %c0_i32, %c0_i32_0 : i32, i32, i32
  }
  func.func @transform_3(%arg0: i32, %arg1: i32) -> (i32, i32, i32) {
    %c0_i32 = arith.constant 0 : i32
    %c0_i32_0 = arith.constant 0 : i32
    %c0_i32_1 = arith.constant 0 : i32
    return %arg1, %c0_i32, %c0_i32_0 : i32, i32, i32
  }
  func.func @transform_4(%arg0: i32, %arg1: i32) -> (i32, i32) {
    %c0_i32 = arith.constant 0 : i32
    %c0_i32_0 = arith.constant 0 : i32
    %c0_i32_1 = arith.constant 0 : i32
    return %c0_i32, %c0_i32_0 : i32, i32
  }
  func.func @transform_5(%arg0: i32, %arg1: i32) -> (i32, i32) {
    %c0_i32 = arith.constant 0 : i32
    %c0_i32_0 = arith.constant 0 : i32
    %c0_i32_1 = arith.constant 0 : i32
    return %c0_i32, %c0_i32_0 : i32, i32
  }
  func.func @transform_6(%arg0: i32, %arg1: i32) -> i32 {
    %c0_i32 = arith.constant 0 : i32
    %c0_i32_0 = arith.constant 0 : i32
    return %c0_i32 : i32
  }
  func.func @transform_7(%arg0: i32, %arg1: i32) -> (i32, i32) {
    %c0_i32 = arith.constant 0 : i32
    %c0_i32_0 = arith.constant 0 : i32
    return %arg0, %c0_i32 : i32, i32
  }
}

module attributes {stable_mosaic.version = 11 : i64} {
  func.func @kernel(%arg0: i32, %arg1: i32, %arg2: memref<1x16x128xbf16, #tpu.memory_space<vmem>>, %arg3: memref<1x1x16xf32, #tpu.memory_space<vmem>>, %arg4: memref<1x16x1xf32, #tpu.memory_space<vmem>>, %arg5: memref<16x16xbf16, #tpu.memory_space<vmem>>, %arg6: memref<1x1x128xf32, #tpu.memory_space<vmem>>, %arg7: memref<2xf32, #tpu.memory_space<smem>>, %arg8: memref<16x128xf32, #tpu.memory_space<vmem>>, %arg9: memref<16x128xf32, #tpu.memory_space<vmem>>) attributes {dimension_semantics = [#tpu.dimension_semantics<parallel>, #tpu.dimension_semantics<arbitrary>], iteration_bounds = array<i64: 1, 4>, scalar_prefetch = 0 : i64, scratch_operands = 1 : i64, tpu.core_type = #tpu.core_type<tc>, window_params = [{transform_indices = @transform_0, window_bounds = array<i64: 1, 16, 128>}, {transform_indices = @transform_1, window_bounds = array<i64: 1, 1, 16>}, {transform_indices = @transform_2, window_bounds = array<i64: 1, 16, 1>}, {transform_indices = @transform_3, window_bounds = array<i64: 16, 16>}, {transform_indices = @transform_4, window_bounds = array<i64: 1, 1, 128>}, {transform_indices = @transform_5, window_bounds = array<i64: 2>}, {transform_indices = @transform_6, window_bounds = array<i64: 16, 128>}]} {
    %c0_i32 = arith.constant 0 : i32
    %0 = arith.cmpi eq, %arg1, %c0_i32 : i32
    %1 = arith.extui %0 : i1 to i32
    %c0_i32_0 = arith.constant 0 : i32
    %2 = arith.cmpi ne, %1, %c0_i32_0 : i32
    scf.if %2 {
      %cst_31 = arith.constant 0.000000e+00 : f32
      %58 = vector.broadcast %cst_31 : f32 to vector<16x128xf32>
      %c0_32 = arith.constant 0 : index
      %c0_33 = arith.constant 0 : index
      %59 = vector.load %arg9[%c0_32, %c0_33] : memref<16x128xf32, #tpu.memory_space<vmem>>, vector<16x128xf32>
      tpu.vector_store %arg9[%c0_32, %c0_33], %58 {strides = array<i32>} : memref<16x128xf32, #tpu.memory_space<vmem>>, vector<16x128xf32>,
    } else {
    }
    %c0 = arith.constant 0 : index
    %c0_1 = arith.constant 0 : index
    %3 = vector.load %arg5[%c0, %c0_1] : memref<16x16xbf16, #tpu.memory_space<vmem>>, vector<16x16xbf16>
    %cst = arith.constant 0.000000e+00 : bf16
    %4 = vector.broadcast %cst : bf16 to vector<16x16xbf16>
    %5 = arith.cmpf ogt, %3, %4 : vector<16x16xbf16>
    %c0_2 = arith.constant 0 : index
    %c0_3 = arith.constant 0 : index
    %c0_4 = arith.constant 0 : index
    %6 = vector.load %arg4[%c0_2, %c0_3, %c0_4] : memref<1x16x1xf32, #tpu.memory_space<vmem>>, vector<1x16x1xf32>
    %7 = vector.shape_cast %6 : vector<1x16x1xf32> to vector<16x1xf32>
    %c0_5 = arith.constant 0 : index
    %c0_6 = arith.constant 0 : index
    %c0_7 = arith.constant 0 : index
    %8 = vector.load %arg3[%c0_5, %c0_6, %c0_7] : memref<1x1x16xf32, #tpu.memory_space<vmem>>, vector<1x1x16xf32>
    %9 = vector.shape_cast %8 : vector<1x1x16xf32> to vector<1x16xf32>
    %10 = vector.broadcast %7 : vector<16x1xf32> to vector<16x16xf32>
    %11 = vector.broadcast %9 : vector<1x16xf32> to vector<16x16xf32>
    %12 = arith.addf %10, %11 : vector<16x16xf32>
    %cst_8 = arith.constant 0.000000e+00 : f32
    %13 = vector.broadcast %cst_8 : f32 to vector<16x16xf32>
    %14 = arith.cmpf oge, %12, %13 : vector<16x16xf32>
    %cst_9 = arith.constant 2.000000e-01 : f32
    %15 = vector.broadcast %cst_9 : f32 to vector<16x16xf32>
    %16 = arith.mulf %15, %12 : vector<16x16xf32>
    %17 = arith.select %14, %12, %16 : vector<16x16xi1>, vector<16x16xf32>
    %cst_10 = arith.constant -1.000000e+30 : f32
    %18 = vector.broadcast %cst_10 : f32 to vector<16x16xf32>
    %19 = arith.select %5, %17, %18 : vector<16x16xi1>, vector<16x16xf32>
    %cst_11 = arith.constant dense<0xFF800000> : vector<16xf32>
    %20 = vector.multi_reduction <maximumf>, %19, %cst_11 [1] : vector<16x16xf32> to vector<16xf32>
    %21 = vector.shape_cast %20 : vector<16xf32> to vector<16x1xf32>
    %22 = vector.broadcast %21 : vector<16x1xf32> to vector<16x16xf32>
    %23 = arith.subf %19, %22 : vector<16x16xf32>
    %24 = math.exp %23 : vector<16x16xf32>
    %cst_12 = arith.constant 0.000000e+00 : f32
    %25 = vector.broadcast %cst_12 : f32 to vector<16x16xf32>
    %26 = arith.select %5, %24, %25 : vector<16x16xi1>, vector<16x16xf32>
    %cst_13 = arith.constant dense<0.000000e+00> : vector<16xf32>
    %27 = vector.multi_reduction <add>, %26, %cst_13 [1] : vector<16x16xf32> to vector<16xf32>
    %28 = vector.shape_cast %27 : vector<16xf32> to vector<16x1xf32>
    %cst_14 = arith.constant 0.000000e+00 : f32
    %29 = vector.broadcast %cst_14 : f32 to vector<16x1xf32>
    %30 = arith.cmpf ogt, %28, %29 : vector<16x1xf32>
    %cst_15 = arith.constant 9.99999968E-21 : f32
    %31 = vector.broadcast %cst_15 : f32 to vector<16x1xf32>
    %32 = arith.maximumf %28, %31 : vector<16x1xf32>
    %33 = tpu.reciprocal %32 {approx = true} : vector<16x1xf32> -> vector<16x1xf32>
    %cst_16 = arith.constant 0.000000e+00 : f32
    %34 = vector.broadcast %cst_16 : f32 to vector<16x1xf32>
    %35 = arith.select %30, %33, %34 : vector<16x1xi1>, vector<16x1xf32>
    %36 = vector.broadcast %35 : vector<16x1xf32> to vector<16x16xf32>
    %37 = arith.mulf %26, %36 : vector<16x16xf32>
    %38 = arith.truncf %37 : vector<16x16xf32> to vector<16x16xbf16>
    %c0_17 = arith.constant 0 : index
    %c0_18 = arith.constant 0 : index
    %c0_19 = arith.constant 0 : index
    %39 = vector.load %arg2[%c0_17, %c0_18, %c0_19] : memref<1x16x128xbf16, #tpu.memory_space<vmem>>, vector<1x16x128xbf16>
    %40 = vector.shape_cast %39 : vector<1x16x128xbf16> to vector<16x128xbf16>
    %cst_20 = arith.constant dense<0.000000e+00> : vector<16x128xf32>
    %41 = tpu.matmul %38, %40, %cst_20 {dimension_numbers = #tpu.dot_dimension_numbers<[1], [0], [0], [1], [0, 0, 1, 1], [], []>} : vector<16x16xbf16>, vector<16x128xbf16>, vector<16x128xf32> -> vector<16x128xf32>
    %c0_21 = arith.constant 0 : index
    %c0_22 = arith.constant 0 : index
    %c0_23 = arith.constant 0 : index
    %42 = vector.load %arg6[%c0_21, %c0_22, %c0_23] : memref<1x1x128xf32, #tpu.memory_space<vmem>>, vector<1x1x128xf32>
    %43 = vector.shape_cast %42 : vector<1x1x128xf32> to vector<1x128xf32>
    %44 = vector.broadcast %43 : vector<1x128xf32> to vector<16x128xf32>
    %45 = arith.addf %41, %44 : vector<16x128xf32>
    %c0_24 = arith.constant 0 : index
    %46 = memref.load %arg7[%c0_24] : memref<2xf32, #tpu.memory_space<smem>>
    %cst_25 = arith.constant 0.000000e+00 : f32
    %47 = vector.broadcast %cst_25 : f32 to vector<16x128xf32>
    %48 = arith.cmpf oge, %45, %47 : vector<16x128xf32>
    %49 = vector.broadcast %46 : f32 to vector<16x128xf32>
    %50 = arith.mulf %49, %45 : vector<16x128xf32>
    %51 = arith.select %48, %45, %50 : vector<16x128xi1>, vector<16x128xf32>
    %c0_26 = arith.constant 0 : index
    %c0_27 = arith.constant 0 : index
    %52 = vector.load %arg9[%c0_26, %c0_27] : memref<16x128xf32, #tpu.memory_space<vmem>>, vector<16x128xf32>
    %53 = arith.addf %52, %51 : vector<16x128xf32>
    %c0_28 = arith.constant 0 : index
    %c0_29 = arith.constant 0 : index
    %54 = vector.load %arg9[%c0_28, %c0_29] : memref<16x128xf32, #tpu.memory_space<vmem>>, vector<16x128xf32>
    tpu.vector_store %arg9[%c0_28, %c0_29], %53 {strides = array<i32>} : memref<16x128xf32, #tpu.memory_space<vmem>>, vector<16x128xf32>,
    %c3_i32 = arith.constant 3 : i32
    %55 = arith.cmpi eq, %arg1, %c3_i32 : i32
    %56 = arith.extui %55 : i1 to i32
    %c0_i32_30 = arith.constant 0 : i32
    %57 = arith.cmpi ne, %56, %c0_i32_30 : i32
    scf.if %57 {
      %c1 = arith.constant 1 : index
      %58 = memref.load %arg7[%c1] : memref<2xf32, #tpu.memory_space<smem>>
      %c0_31 = arith.constant 0 : index
      %c0_32 = arith.constant 0 : index
      %59 = vector.load %arg9[%c0_31, %c0_32] : memref<16x128xf32, #tpu.memory_space<vmem>>, vector<16x128xf32>
      %cst_33 = arith.constant 2.500000e-01 : f32
      %60 = vector.broadcast %cst_33 : f32 to vector<16x128xf32>
      %61 = arith.mulf %59, %60 : vector<16x128xf32>
      %cst_34 = arith.constant 0.000000e+00 : f32
      %62 = vector.broadcast %cst_34 : f32 to vector<16x128xf32>
      %63 = arith.cmpf oge, %61, %62 : vector<16x128xf32>
      %64 = vector.broadcast %58 : f32 to vector<16x128xf32>
      %65 = arith.mulf %64, %61 : vector<16x128xf32>
      %66 = arith.select %63, %61, %65 : vector<16x128xi1>, vector<16x128xf32>
      %c0_35 = arith.constant 0 : index
      %c0_36 = arith.constant 0 : index
      %67 = vector.load %arg8[%c0_35, %c0_36] : memref<16x128xf32, #tpu.memory_space<vmem>>, vector<16x128xf32>
      tpu.vector_store %arg8[%c0_35, %c0_36], %66 {strides = array<i32>} : memref<16x128xf32, #tpu.memory_space<vmem>>, vector<16x128xf32>,
    } else {
    }
    return
  }
  func.func @transform_0(%arg0: i32, %arg1: i32) -> (i32, i32, i32) {
    %c0_i32 = arith.constant 0 : i32
    %c0_i32_0 = arith.constant 0 : i32
    %c0_i32_1 = arith.constant 0 : i32
    return %arg1, %c0_i32, %c0_i32_0 : i32, i32, i32
  }
  func.func @transform_1(%arg0: i32, %arg1: i32) -> (i32, i32, i32) {
    %c0_i32 = arith.constant 0 : i32
    %c0_i32_0 = arith.constant 0 : i32
    %c0_i32_1 = arith.constant 0 : i32
    return %arg1, %c0_i32, %c0_i32_0 : i32, i32, i32
  }
  func.func @transform_2(%arg0: i32, %arg1: i32) -> (i32, i32, i32) {
    %c0_i32 = arith.constant 0 : i32
    %c0_i32_0 = arith.constant 0 : i32
    return %arg1, %arg0, %c0_i32 : i32, i32, i32
  }
  func.func @transform_3(%arg0: i32, %arg1: i32) -> (i32, i32) {
    %c0_i32 = arith.constant 0 : i32
    %c0_i32_0 = arith.constant 0 : i32
    return %arg0, %c0_i32 : i32, i32
  }
  func.func @transform_4(%arg0: i32, %arg1: i32) -> (i32, i32, i32) {
    %c0_i32 = arith.constant 0 : i32
    %c0_i32_0 = arith.constant 0 : i32
    %c0_i32_1 = arith.constant 0 : i32
    return %arg1, %c0_i32, %c0_i32_0 : i32, i32, i32
  }
  func.func @transform_5(%arg0: i32, %arg1: i32) -> i32 {
    %c0_i32 = arith.constant 0 : i32
    %c0_i32_0 = arith.constant 0 : i32
    return %c0_i32 : i32
  }
  func.func @transform_6(%arg0: i32, %arg1: i32) -> (i32, i32) {
    %c0_i32 = arith.constant 0 : i32
    %c0_i32_0 = arith.constant 0 : i32
    return %arg0, %c0_i32 : i32, i32
  }
}

module attributes {stable_mosaic.version = 11 : i64} {
  func.func @kernel(%arg0: i32, %arg1: memref<8x32xbf16, #tpu.memory_space<vmem>>, %arg2: memref<8x32xbf16, #tpu.memory_space<vmem>>, %arg3: memref<8x32xbf16, #tpu.memory_space<vmem>>, %arg4: memref<8x32xbf16, #tpu.memory_space<vmem>>, %arg5: memref<8x32xbf16, #tpu.memory_space<vmem>>, %arg6: memref<32x128xbf16, #tpu.memory_space<vmem>>, %arg7: memref<1x128xf32, #tpu.memory_space<vmem>>, %arg8: memref<1x128xf32, #tpu.memory_space<vmem>>, %arg9: memref<1x5xf32, #tpu.memory_space<vmem>>) attributes {dimension_semantics = [#tpu.dimension_semantics<arbitrary>], iteration_bounds = array<i64: 1>, scalar_prefetch = 0 : i64, scratch_operands = 0 : i64, tpu.core_type = #tpu.core_type<tc>, window_params = [{pipeline_mode = #tpu.pipeline_mode<synchronous>, transform_indices = @transform_0, window_bounds = array<i64: 8, 32>}, {pipeline_mode = #tpu.pipeline_mode<synchronous>, transform_indices = @transform_1, window_bounds = array<i64: 8, 32>}, {pipeline_mode = #tpu.pipeline_mode<synchronous>, transform_indices = @transform_2, window_bounds = array<i64: 8, 32>}, {pipeline_mode = #tpu.pipeline_mode<synchronous>, transform_indices = @transform_3, window_bounds = array<i64: 8, 32>}, {pipeline_mode = #tpu.pipeline_mode<synchronous>, transform_indices = @transform_4, window_bounds = array<i64: 8, 32>}, {pipeline_mode = #tpu.pipeline_mode<synchronous>, transform_indices = @transform_5, window_bounds = array<i64: 32, 128>}, {pipeline_mode = #tpu.pipeline_mode<synchronous>, transform_indices = @transform_6, window_bounds = array<i64: 1, 128>}, {pipeline_mode = #tpu.pipeline_mode<synchronous>, transform_indices = @transform_7, window_bounds = array<i64: 1, 128>}, {pipeline_mode = #tpu.pipeline_mode<synchronous>, transform_indices = @transform_8, window_bounds = array<i64: 1, 5>}]} {
    %cst = arith.constant 0.000000e+00 : f32
    %0 = vector.broadcast %cst : f32 to vector<1x5xf32>
    %1 = tpu.iota {dimensions = array<i32: 1>} : vector<1x5xi32>
    %c0 = arith.constant 0 : index
    %c0_0 = arith.constant 0 : index
    %2 = vector.load %arg1[%c0, %c0_0] : memref<8x32xbf16, #tpu.memory_space<vmem>>, vector<8x32xbf16>
    %c0_1 = arith.constant 0 : index
    %c0_2 = arith.constant 0 : index
    %3 = vector.load %arg6[%c0_1, %c0_2] : memref<32x128xbf16, #tpu.memory_space<vmem>>, vector<32x128xbf16>
    %cst_3 = arith.constant dense<0.000000e+00> : vector<8x128xf32>
    %4 = tpu.matmul %2, %3, %cst_3 {dimension_numbers = #tpu.dot_dimension_numbers<[1], [0], [0], [1], [0, 0, 1, 1], [], []>} : vector<8x32xbf16>, vector<32x128xbf16>, vector<8x128xf32> -> vector<8x128xf32>
    %c0_4 = arith.constant 0 : index
    %c0_5 = arith.constant 0 : index
    %5 = vector.load %arg7[%c0_4, %c0_5] : memref<1x128xf32, #tpu.memory_space<vmem>>, vector<1x128xf32>
    %6 = vector.broadcast %5 : vector<1x128xf32> to vector<8x128xf32>
    %7 = arith.addf %4, %6 : vector<8x128xf32>
    %8 = math.tanh %7 : vector<8x128xf32>
    %c0_6 = arith.constant 0 : index
    %c0_7 = arith.constant 0 : index
    %9 = vector.load %arg8[%c0_6, %c0_7] : memref<1x128xf32, #tpu.memory_space<vmem>>, vector<1x128xf32>
    %10 = vector.broadcast %9 : vector<1x128xf32> to vector<8x128xf32>
    %11 = arith.mulf %8, %10 : vector<8x128xf32>
    %cst_8 = arith.constant dense<0.000000e+00> : vector<8xf32>
    %12 = vector.multi_reduction <add>, %11, %cst_8 [1] : vector<8x128xf32> to vector<8xf32>
    %13 = vector.shape_cast %12 : vector<8xf32> to vector<8x1xf32>
    %14 = vector.shape_cast %13 : vector<8x1xf32> to vector<1x8x1xf32>
    %cst_9 = arith.constant dense<0.000000e+00> : vector<1xf32>
    %15 = vector.multi_reduction <add>, %14, %cst_9 [1, 2] : vector<1x8x1xf32> to vector<1xf32>
    %16 = vector.shape_cast %15 : vector<1xf32> to vector<1x1x1xf32>
    %17 = vector.extract %16[0, 0, 0] : f32 from vector<1x1x1xf32>
    %cst_10 = arith.constant 8.000000e+00 : f32
    %18 = arith.divf %17, %cst_10 : f32
    %c0_i32 = arith.constant 0 : i32
    %19 = vector.broadcast %c0_i32 : i32 to vector<1x5xi32>
    %20 = arith.cmpi eq, %1, %19 : vector<1x5xi32>
    %21 = arith.extui %20 : vector<1x5xi1> to vector<1x5xi32>
    %22 = arith.sitofp %21 : vector<1x5xi32> to vector<1x5xf32>
    %23 = vector.broadcast %18 : f32 to vector<1x5xf32>
    %24 = arith.mulf %23, %22 : vector<1x5xf32>
    %25 = arith.addf %0, %24 : vector<1x5xf32>
    %c0_11 = arith.constant 0 : index
    %c0_12 = arith.constant 0 : index
    %26 = vector.load %arg2[%c0_11, %c0_12] : memref<8x32xbf16, #tpu.memory_space<vmem>>, vector<8x32xbf16>
    %c0_13 = arith.constant 0 : index
    %c0_14 = arith.constant 0 : index
    %27 = vector.load %arg6[%c0_13, %c0_14] : memref<32x128xbf16, #tpu.memory_space<vmem>>, vector<32x128xbf16>
    %cst_15 = arith.constant dense<0.000000e+00> : vector<8x128xf32>
    %28 = tpu.matmul %26, %27, %cst_15 {dimension_numbers = #tpu.dot_dimension_numbers<[1], [0], [0], [1], [0, 0, 1, 1], [], []>} : vector<8x32xbf16>, vector<32x128xbf16>, vector<8x128xf32> -> vector<8x128xf32>
    %c0_16 = arith.constant 0 : index
    %c0_17 = arith.constant 0 : index
    %29 = vector.load %arg7[%c0_16, %c0_17] : memref<1x128xf32, #tpu.memory_space<vmem>>, vector<1x128xf32>
    %30 = vector.broadcast %29 : vector<1x128xf32> to vector<8x128xf32>
    %31 = arith.addf %28, %30 : vector<8x128xf32>
    %32 = math.tanh %31 : vector<8x128xf32>
    %c0_18 = arith.constant 0 : index
    %c0_19 = arith.constant 0 : index
    %33 = vector.load %arg8[%c0_18, %c0_19] : memref<1x128xf32, #tpu.memory_space<vmem>>, vector<1x128xf32>
    %34 = vector.broadcast %33 : vector<1x128xf32> to vector<8x128xf32>
    %35 = arith.mulf %32, %34 : vector<8x128xf32>
    %cst_20 = arith.constant dense<0.000000e+00> : vector<8xf32>
    %36 = vector.multi_reduction <add>, %35, %cst_20 [1] : vector<8x128xf32> to vector<8xf32>
    %37 = vector.shape_cast %36 : vector<8xf32> to vector<8x1xf32>
    %38 = vector.shape_cast %37 : vector<8x1xf32> to vector<1x8x1xf32>
    %cst_21 = arith.constant dense<0.000000e+00> : vector<1xf32>
    %39 = vector.multi_reduction <add>, %38, %cst_21 [1, 2] : vector<1x8x1xf32> to vector<1xf32>
    %40 = vector.shape_cast %39 : vector<1xf32> to vector<1x1x1xf32>
    %41 = vector.extract %40[0, 0, 0] : f32 from vector<1x1x1xf32>
    %cst_22 = arith.constant 8.000000e+00 : f32
    %42 = arith.divf %41, %cst_22 : f32
    %c1_i32 = arith.constant 1 : i32
    %43 = vector.broadcast %c1_i32 : i32 to vector<1x5xi32>
    %44 = arith.cmpi eq, %1, %43 : vector<1x5xi32>
    %45 = arith.extui %44 : vector<1x5xi1> to vector<1x5xi32>
    %46 = arith.sitofp %45 : vector<1x5xi32> to vector<1x5xf32>
    %47 = vector.broadcast %42 : f32 to vector<1x5xf32>
    %48 = arith.mulf %47, %46 : vector<1x5xf32>
    %49 = arith.addf %25, %48 : vector<1x5xf32>
    %c0_23 = arith.constant 0 : index
    %c0_24 = arith.constant 0 : index
    %50 = vector.load %arg3[%c0_23, %c0_24] : memref<8x32xbf16, #tpu.memory_space<vmem>>, vector<8x32xbf16>
    %c0_25 = arith.constant 0 : index
    %c0_26 = arith.constant 0 : index
    %51 = vector.load %arg6[%c0_25, %c0_26] : memref<32x128xbf16, #tpu.memory_space<vmem>>, vector<32x128xbf16>
    %cst_27 = arith.constant dense<0.000000e+00> : vector<8x128xf32>
    %52 = tpu.matmul %50, %51, %cst_27 {dimension_numbers = #tpu.dot_dimension_numbers<[1], [0], [0], [1], [0, 0, 1, 1], [], []>} : vector<8x32xbf16>, vector<32x128xbf16>, vector<8x128xf32> -> vector<8x128xf32>
    %c0_28 = arith.constant 0 : index
    %c0_29 = arith.constant 0 : index
    %53 = vector.load %arg7[%c0_28, %c0_29] : memref<1x128xf32, #tpu.memory_space<vmem>>, vector<1x128xf32>
    %54 = vector.broadcast %53 : vector<1x128xf32> to vector<8x128xf32>
    %55 = arith.addf %52, %54 : vector<8x128xf32>
    %56 = math.tanh %55 : vector<8x128xf32>
    %c0_30 = arith.constant 0 : index
    %c0_31 = arith.constant 0 : index
    %57 = vector.load %arg8[%c0_30, %c0_31] : memref<1x128xf32, #tpu.memory_space<vmem>>, vector<1x128xf32>
    %58 = vector.broadcast %57 : vector<1x128xf32> to vector<8x128xf32>
    %59 = arith.mulf %56, %58 : vector<8x128xf32>
    %cst_32 = arith.constant dense<0.000000e+00> : vector<8xf32>
    %60 = vector.multi_reduction <add>, %59, %cst_32 [1] : vector<8x128xf32> to vector<8xf32>
    %61 = vector.shape_cast %60 : vector<8xf32> to vector<8x1xf32>
    %62 = vector.shape_cast %61 : vector<8x1xf32> to vector<1x8x1xf32>
    %cst_33 = arith.constant dense<0.000000e+00> : vector<1xf32>
    %63 = vector.multi_reduction <add>, %62, %cst_33 [1, 2] : vector<1x8x1xf32> to vector<1xf32>
    %64 = vector.shape_cast %63 : vector<1xf32> to vector<1x1x1xf32>
    %65 = vector.extract %64[0, 0, 0] : f32 from vector<1x1x1xf32>
    %cst_34 = arith.constant 8.000000e+00 : f32
    %66 = arith.divf %65, %cst_34 : f32
    %c2_i32 = arith.constant 2 : i32
    %67 = vector.broadcast %c2_i32 : i32 to vector<1x5xi32>
    %68 = arith.cmpi eq, %1, %67 : vector<1x5xi32>
    %69 = arith.extui %68 : vector<1x5xi1> to vector<1x5xi32>
    %70 = arith.sitofp %69 : vector<1x5xi32> to vector<1x5xf32>
    %71 = vector.broadcast %66 : f32 to vector<1x5xf32>
    %72 = arith.mulf %71, %70 : vector<1x5xf32>
    %73 = arith.addf %49, %72 : vector<1x5xf32>
    %c0_35 = arith.constant 0 : index
    %c0_36 = arith.constant 0 : index
    %74 = vector.load %arg4[%c0_35, %c0_36] : memref<8x32xbf16, #tpu.memory_space<vmem>>, vector<8x32xbf16>
    %c0_37 = arith.constant 0 : index
    %c0_38 = arith.constant 0 : index
    %75 = vector.load %arg6[%c0_37, %c0_38] : memref<32x128xbf16, #tpu.memory_space<vmem>>, vector<32x128xbf16>
    %cst_39 = arith.constant dense<0.000000e+00> : vector<8x128xf32>
    %76 = tpu.matmul %74, %75, %cst_39 {dimension_numbers = #tpu.dot_dimension_numbers<[1], [0], [0], [1], [0, 0, 1, 1], [], []>} : vector<8x32xbf16>, vector<32x128xbf16>, vector<8x128xf32> -> vector<8x128xf32>
    %c0_40 = arith.constant 0 : index
    %c0_41 = arith.constant 0 : index
    %77 = vector.load %arg7[%c0_40, %c0_41] : memref<1x128xf32, #tpu.memory_space<vmem>>, vector<1x128xf32>
    %78 = vector.broadcast %77 : vector<1x128xf32> to vector<8x128xf32>
    %79 = arith.addf %76, %78 : vector<8x128xf32>
    %80 = math.tanh %79 : vector<8x128xf32>
    %c0_42 = arith.constant 0 : index
    %c0_43 = arith.constant 0 : index
    %81 = vector.load %arg8[%c0_42, %c0_43] : memref<1x128xf32, #tpu.memory_space<vmem>>, vector<1x128xf32>
    %82 = vector.broadcast %81 : vector<1x128xf32> to vector<8x128xf32>
    %83 = arith.mulf %80, %82 : vector<8x128xf32>
    %cst_44 = arith.constant dense<0.000000e+00> : vector<8xf32>
    %84 = vector.multi_reduction <add>, %83, %cst_44 [1] : vector<8x128xf32> to vector<8xf32>
    %85 = vector.shape_cast %84 : vector<8xf32> to vector<8x1xf32>
    %86 = vector.shape_cast %85 : vector<8x1xf32> to vector<1x8x1xf32>
    %cst_45 = arith.constant dense<0.000000e+00> : vector<1xf32>
    %87 = vector.multi_reduction <add>, %86, %cst_45 [1, 2] : vector<1x8x1xf32> to vector<1xf32>
    %88 = vector.shape_cast %87 : vector<1xf32> to vector<1x1x1xf32>
    %89 = vector.extract %88[0, 0, 0] : f32 from vector<1x1x1xf32>
    %cst_46 = arith.constant 8.000000e+00 : f32
    %90 = arith.divf %89, %cst_46 : f32
    %c3_i32 = arith.constant 3 : i32
    %91 = vector.broadcast %c3_i32 : i32 to vector<1x5xi32>
    %92 = arith.cmpi eq, %1, %91 : vector<1x5xi32>
    %93 = arith.extui %92 : vector<1x5xi1> to vector<1x5xi32>
    %94 = arith.sitofp %93 : vector<1x5xi32> to vector<1x5xf32>
    %95 = vector.broadcast %90 : f32 to vector<1x5xf32>
    %96 = arith.mulf %95, %94 : vector<1x5xf32>
    %97 = arith.addf %73, %96 : vector<1x5xf32>
    %c0_47 = arith.constant 0 : index
    %c0_48 = arith.constant 0 : index
    %98 = vector.load %arg5[%c0_47, %c0_48] : memref<8x32xbf16, #tpu.memory_space<vmem>>, vector<8x32xbf16>
    %c0_49 = arith.constant 0 : index
    %c0_50 = arith.constant 0 : index
    %99 = vector.load %arg6[%c0_49, %c0_50] : memref<32x128xbf16, #tpu.memory_space<vmem>>, vector<32x128xbf16>
    %cst_51 = arith.constant dense<0.000000e+00> : vector<8x128xf32>
    %100 = tpu.matmul %98, %99, %cst_51 {dimension_numbers = #tpu.dot_dimension_numbers<[1], [0], [0], [1], [0, 0, 1, 1], [], []>} : vector<8x32xbf16>, vector<32x128xbf16>, vector<8x128xf32> -> vector<8x128xf32>
    %c0_52 = arith.constant 0 : index
    %c0_53 = arith.constant 0 : index
    %101 = vector.load %arg7[%c0_52, %c0_53] : memref<1x128xf32, #tpu.memory_space<vmem>>, vector<1x128xf32>
    %102 = vector.broadcast %101 : vector<1x128xf32> to vector<8x128xf32>
    %103 = arith.addf %100, %102 : vector<8x128xf32>
    %104 = math.tanh %103 : vector<8x128xf32>
    %c0_54 = arith.constant 0 : index
    %c0_55 = arith.constant 0 : index
    %105 = vector.load %arg8[%c0_54, %c0_55] : memref<1x128xf32, #tpu.memory_space<vmem>>, vector<1x128xf32>
    %106 = vector.broadcast %105 : vector<1x128xf32> to vector<8x128xf32>
    %107 = arith.mulf %104, %106 : vector<8x128xf32>
    %cst_56 = arith.constant dense<0.000000e+00> : vector<8xf32>
    %108 = vector.multi_reduction <add>, %107, %cst_56 [1] : vector<8x128xf32> to vector<8xf32>
    %109 = vector.shape_cast %108 : vector<8xf32> to vector<8x1xf32>
    %110 = vector.shape_cast %109 : vector<8x1xf32> to vector<1x8x1xf32>
    %cst_57 = arith.constant dense<0.000000e+00> : vector<1xf32>
    %111 = vector.multi_reduction <add>, %110, %cst_57 [1, 2] : vector<1x8x1xf32> to vector<1xf32>
    %112 = vector.shape_cast %111 : vector<1xf32> to vector<1x1x1xf32>
    %113 = vector.extract %112[0, 0, 0] : f32 from vector<1x1x1xf32>
    %cst_58 = arith.constant 8.000000e+00 : f32
    %114 = arith.divf %113, %cst_58 : f32
    %c4_i32 = arith.constant 4 : i32
    %115 = vector.broadcast %c4_i32 : i32 to vector<1x5xi32>
    %116 = arith.cmpi eq, %1, %115 : vector<1x5xi32>
    %117 = arith.extui %116 : vector<1x5xi1> to vector<1x5xi32>
    %118 = arith.sitofp %117 : vector<1x5xi32> to vector<1x5xf32>
    %119 = vector.broadcast %114 : f32 to vector<1x5xf32>
    %120 = arith.mulf %119, %118 : vector<1x5xf32>
    %121 = arith.addf %97, %120 : vector<1x5xf32>
    %c0_59 = arith.constant 0 : index
    %c0_60 = arith.constant 0 : index
    %122 = vector.load %arg9[%c0_59, %c0_60] : memref<1x5xf32, #tpu.memory_space<vmem>>, vector<1x5xf32>
    tpu.vector_store %arg9[%c0_59, %c0_60], %121 {strides = array<i32>} : memref<1x5xf32, #tpu.memory_space<vmem>>, vector<1x5xf32>,
    return
  }
  func.func @transform_0(%arg0: i32) -> (i32, i32) {
    %c0_i32 = arith.constant 0 : i32
    %c0_i32_0 = arith.constant 0 : i32
    %c0_i32_1 = arith.constant 0 : i32
    return %c0_i32, %c0_i32_0 : i32, i32
  }
  func.func @transform_1(%arg0: i32) -> (i32, i32) {
    %c0_i32 = arith.constant 0 : i32
    %c0_i32_0 = arith.constant 0 : i32
    %c0_i32_1 = arith.constant 0 : i32
    return %c0_i32, %c0_i32_0 : i32, i32
  }
  func.func @transform_2(%arg0: i32) -> (i32, i32) {
    %c0_i32 = arith.constant 0 : i32
    %c0_i32_0 = arith.constant 0 : i32
    %c0_i32_1 = arith.constant 0 : i32
    return %c0_i32, %c0_i32_0 : i32, i32
  }
  func.func @transform_3(%arg0: i32) -> (i32, i32) {
    %c0_i32 = arith.constant 0 : i32
    %c0_i32_0 = arith.constant 0 : i32
    %c0_i32_1 = arith.constant 0 : i32
    return %c0_i32, %c0_i32_0 : i32, i32
  }
  func.func @transform_4(%arg0: i32) -> (i32, i32) {
    %c0_i32 = arith.constant 0 : i32
    %c0_i32_0 = arith.constant 0 : i32
    %c0_i32_1 = arith.constant 0 : i32
    return %c0_i32, %c0_i32_0 : i32, i32
  }
  func.func @transform_5(%arg0: i32) -> (i32, i32) {
    %c0_i32 = arith.constant 0 : i32
    %c0_i32_0 = arith.constant 0 : i32
    %c0_i32_1 = arith.constant 0 : i32
    return %c0_i32, %c0_i32_0 : i32, i32
  }
  func.func @transform_6(%arg0: i32) -> (i32, i32) {
    %c0_i32 = arith.constant 0 : i32
    %c0_i32_0 = arith.constant 0 : i32
    %c0_i32_1 = arith.constant 0 : i32
    return %c0_i32, %c0_i32_0 : i32, i32
  }
  func.func @transform_7(%arg0: i32) -> (i32, i32) {
    %c0_i32 = arith.constant 0 : i32
    %c0_i32_0 = arith.constant 0 : i32
    %c0_i32_1 = arith.constant 0 : i32
    return %c0_i32, %c0_i32_0 : i32, i32
  }
  func.func @transform_8(%arg0: i32) -> (i32, i32) {
    %c0_i32 = arith.constant 0 : i32
    %c0_i32_0 = arith.constant 0 : i32
    %c0_i32_1 = arith.constant 0 : i32
    return %c0_i32, %c0_i32_0 : i32, i32
  }
}

module attributes {stable_mosaic.version = 11 : i64} {
  func.func @_decoder_kernel(%arg0: i32, %arg1: memref<8x32xbf16, #tpu.memory_space<vmem>>, %arg2: memref<32x32xbf16, #tpu.memory_space<vmem>>, %arg3: memref<32x8xbf16, #tpu.memory_space<vmem>>, %arg4: memref<8x8xf32, #tpu.memory_space<vmem>>) attributes {dimension_semantics = [#tpu.dimension_semantics<parallel>], iteration_bounds = array<i64: 1>, scalar_prefetch = 0 : i64, scratch_operands = 0 : i64, tpu.core_type = #tpu.core_type<tc>, window_params = [{transform_indices = @transform_0, window_bounds = array<i64: 8, 32>}, {pipeline_mode = #tpu.pipeline_mode<synchronous>, transform_indices = @transform_1, window_bounds = array<i64: 32, 32>}, {pipeline_mode = #tpu.pipeline_mode<synchronous>, transform_indices = @transform_2, window_bounds = array<i64: 32, 8>}, {transform_indices = @transform_3, window_bounds = array<i64: 8, 8>}]} {
    %c0 = arith.constant 0 : index
    %c0_0 = arith.constant 0 : index
    %0 = vector.load %arg1[%c0, %c0_0] : memref<8x32xbf16, #tpu.memory_space<vmem>>, vector<8x32xbf16>
    %c0_1 = arith.constant 0 : index
    %c0_2 = arith.constant 0 : index
    %1 = vector.load %arg2[%c0_1, %c0_2] : memref<32x32xbf16, #tpu.memory_space<vmem>>, vector<32x32xbf16>
    %cst = arith.constant dense<0.000000e+00> : vector<8x32xf32>
    %2 = tpu.matmul %0, %1, %cst {dimension_numbers = #tpu.dot_dimension_numbers<[1], [0], [0], [1], [0, 0, 1, 1], [], []>} : vector<8x32xbf16>, vector<32x32xbf16>, vector<8x32xf32> -> vector<8x32xf32>
    %3 = arith.truncf %2 : vector<8x32xf32> to vector<8x32xbf16>
    %c0_3 = arith.constant 0 : index
    %c0_4 = arith.constant 0 : index
    %4 = vector.load %arg3[%c0_3, %c0_4] : memref<32x8xbf16, #tpu.memory_space<vmem>>, vector<32x8xbf16>
    %cst_5 = arith.constant dense<0.000000e+00> : vector<8x8xf32>
    %5 = tpu.matmul %3, %4, %cst_5 {dimension_numbers = #tpu.dot_dimension_numbers<[1], [0], [0], [1], [0, 0, 1, 1], [], []>} : vector<8x32xbf16>, vector<32x8xbf16>, vector<8x8xf32> -> vector<8x8xf32>
    %c0_6 = arith.constant 0 : index
    %c0_7 = arith.constant 0 : index
    %6 = vector.load %arg4[%c0_6, %c0_7] : memref<8x8xf32, #tpu.memory_space<vmem>>, vector<8x8xf32>
    tpu.vector_store %arg4[%c0_6, %c0_7], %5 {strides = array<i32>} : memref<8x8xf32, #tpu.memory_space<vmem>>, vector<8x8xf32>,
    return
  }
  func.func @transform_0(%arg0: i32) -> (i32, i32) {
    %c0_i32 = arith.constant 0 : i32
    %c0_i32_0 = arith.constant 0 : i32
    return %arg0, %c0_i32 : i32, i32
  }
  func.func @transform_1(%arg0: i32) -> (i32, i32) {
    %c0_i32 = arith.constant 0 : i32
    %c0_i32_0 = arith.constant 0 : i32
    %c0_i32_1 = arith.constant 0 : i32
    return %c0_i32, %c0_i32_0 : i32, i32
  }
  func.func @transform_2(%arg0: i32) -> (i32, i32) {
    %c0_i32 = arith.constant 0 : i32
    %c0_i32_0 = arith.constant 0 : i32
    %c0_i32_1 = arith.constant 0 : i32
    return %c0_i32, %c0_i32_0 : i32, i32
  }
  func.func @transform_3(%arg0: i32) -> (i32, i32) {
    %c0_i32 = arith.constant 0 : i32
    %c0_i32_0 = arith.constant 0 : i32
    return %arg0, %c0_i32 : i32, i32
  }
}

</mosaic_0001>

<bundles_post_ra>
// kernel: model_forward.13
= control target key start
LH: loop header
LB: loop body
LE: loop exit
PB: predicated region body
PF: predicated region fallthrough
CT: control target
= control target key end

     0   :  { %v214_v0 = vmov 0.0   ;;  %vm215_vm0 = vmmov 0   ;;  %s285_s1 = inlined_call_operand.vmem [shape: bf16[128,128], index: 1, kind: input, shape index: {}]   ;;  %s286_s0 = inlined_call_operand.vmem [shape: bf16[8,128], index: 0, kind: input, shape index: {}]   ;;  %s287_s2 = inlined_call_operand.vmem [shape: f32[1,128], index: 2, kind: input, shape index: {}]   ;;  %s288_s3 = inlined_call_operand.vmem [shape: f32[1,128], index: 3, kind: input, shape index: {}]   ;;  %s289_s4 = inlined_call_operand.<no memory space> [shape: f32[1], index: 4, kind: input, shape index: {}]   ;;  %s290_s5 = inlined_call_operand.vmem [shape: f32[8,128], index: 5, kind: output, shape index: {}]  }
   0x1   :  { %184 = vmatprep.subr.bf16.mxu0 %v214_v0  ;;  %v206_v1 = vld [vmem:[%s285_s1] sm:$0xff]   ;;  %200 = vmatprep.mubr.msk.bf16.mxu0 %vm215_vm0, %v214_v0  ;;  %v207_v2 = vld [vmem:[%s285_s1 + $0x8] sm:$0xff]   ;;  %v208_v3 = vld [vmem:[%s285_s1 + $0x10] sm:$0xff]   ;;  %v157_v15 = vstv %s289_s4 }
   0x2   :  { %185 = vmatpush3.bf16.msra.mxu0 %v206_v1  ;;  %v209_v4 = vld [vmem:[%s285_s1 + $0x18] sm:$0xff]   ;;  %v210_v5 = vld [vmem:[%s285_s1 + $0x20] sm:$0xff]   ;;  %v211_v6 = vld [vmem:[%s285_s1 + $0x28] sm:$0xff]  }
   0x3   :  { %186 = vmatprep.subr.bf16.mxu0 %v214_v0  ;;  %v212_v7 = vld [vmem:[%s285_s1 + $0x30] sm:$0xff]   ;;  %v213_v8 = vld [vmem:[%s285_s1 + $0x38] sm:$0xff]   ;;  %v28_v9 = vld [vmem:[%s286_s0] sm:$0xf] }
   0x4   :  { %v173_v10 = vld [vmem:[%s287_s2] ss:$0 sm:$0xff] }
   0x5   :  { %v174_v12 = vld [vmem:[%s288_s3] ss:$0 sm:$0xff] }
   0x6   :  { %187 = vmatpush3.bf16.msra.mxu0 %v207_v2 }
   0x7   :  { %188 = vmatprep.subr.bf16.mxu0 %v214_v0 }
   0xa   :  { %189 = vmatpush3.bf16.msra.mxu0 %v208_v3 }
   0xb   :  { %190 = vmatprep.subr.bf16.mxu0 %v214_v0 }
   0xe   :  { %191 = vmatpush3.bf16.msra.mxu0 %v209_v4 }
   0xf   :  { %192 = vmatprep.subr.bf16.mxu0 %v214_v0 }
  0x12   :  { %193 = vmatpush3.bf16.msra.mxu0 %v210_v5 }
  0x13   :  { %194 = vmatprep.subr.bf16.mxu0 %v214_v0 }
  0x16   :  { %195 = vmatpush3.bf16.msra.mxu0 %v211_v6 }
  0x17   :  { %196 = vmatprep.subr.bf16.mxu0 %v214_v0 }
  0x1a   :  { %197 = vmatpush3.bf16.msra.mxu0 %v212_v7 }
  0x1b   :  { %198 = vmatprep.subr.bf16.mxu0 %v214_v0 }
  0x1e   :  { %199 = vmatpush3.bf16.msra.mxu0 %v213_v8 }
  0x21   :  { %201 = vmatmul.mubr.bf16.vlgmr.msra.gmra.mrb[0].mxu0 %v28_v9 }
  0xf4   :  { %v127_v11 = vpop.f32.mrb[0].mxu0 }
  0xf5   :  { %v146_v13 = vmul.f32 %v173_v10, %v127_v11  ;;  %v202_v14 = vpop.f32.mrb[1].mxu0 }
  0xf6   :  { %v130_v16 = vpop.f32.mrb[2].mxu0 }
  0xf7   :  { %v154_v17 = vadd.f32 %v174_v12, %v146_v13  ;;  %v203_v18 = vpop.f32.mrb[3].mxu0 }
  0xf9   :  { %vm156_vm1 = vcmp.ge.f32.partialorder %v154_v17, 0.0  ;;  %v158_v19 = vmul.f32 %v157_v15, %v154_v17 }
  0xfb   :  { %v159_v20 = vsel %vm156_vm1, %v154_v17, %v158_v19 }
  0xfc   :  { %160 = vst [vmem:[%s290_s5] sm:$0xff] %v159_v20 }

// kernel: model_forward.15
= control target key start
LH: loop header
LB: loop body
LE: loop exit
PB: predicated region body
PF: predicated region fallthrough
CT: control target
= control target key end

     0   :  { %s810_s26 = smov 0   ;;  %s812_s27 = smov 0   ;;  %s890_s0 = inlined_call_operand.vmem [shape: bf16[2,8,8], index: 0, kind: input, shape index: {}]   ;;  %s891_s1 = inlined_call_operand.vmem [shape: bf16[2,8,128], index: 1, kind: input, shape index: {}]   ;;  %s892_s2 = inlined_call_operand.vmem [shape: bf16[2,128,128], index: 2, kind: input, shape index: {}]   ;;  %s893_s3 = inlined_call_operand.vmem [shape: f32[2,1,128], index: 3, kind: input, shape index: {}]   ;;  %s894_s4 = inlined_call_operand.vmem [shape: f32[1,128], index: 4, kind: input, shape index: {}]   ;;  %s895_s5 = inlined_call_operand.vmem [shape: f32[1,128], index: 5, kind: input, shape index: {}]   ;;  %s896_s6 = inlined_call_operand.<no memory space> [shape: f32[1], index: 6, kind: input, shape index: {}]   ;;  %s897_s7 = inlined_call_operand.vmem [shape: f32[8,128], index: 7, kind: output, shape index: {}]  }
   0x1   :  { %12 = sst [smem:[#allocation3]] %s896_s6  ;;  %s814_s28 = smov 0  }
   0x2 LB: > { %s27_s6 = sadd.s32 1, %s758_s27  ;;  %p645_p0 = scmp.ge.s32.totalorder %s762_s28, 1  ;;  %s762_s28 = sphi %s814_s28, %s18_s28   ;;  %s758_s27 = sphi %s812_s27, %s899_s27   ;;  %s754_s26 = sphi %s810_s26, %s898_s26  }
   0x3   : > { %p28_p1 = scmp.ge.s32.totalorder %s27_s6, 2  ;;  %p281_p2 = scmp.lt.s32.totalorder %s762_s28, 3 }
   0x5   : > { %s901_s6 = smov (%p28_p1, %s27_s6), 0  ;;  %p282_p3 = pnand %p645_p0, %p281_p2 }
   0x6   : > { %p326_p4 = scmp.lt.s32.totalorder (!%p282_p3), %s754_s26, 1  ;;  %p650_p5 = scmp.ne.s32.totalorder (!%p282_p3), %s754_s26, 0 }
   0x7   : > { %285 = sbr.rel (%p282_p3) target bundleno = 505 (0x1f9), region = 48 }
   0xe   : > { %s832_s29 = scalar_select %p326_p4, %s754_s26, 1 }
   0xf   : > { %353 = sbr.rel (%p650_p5) target bundleno = 22 (0x16), region = 52  ;;  %v764_v0 = vmov (!%p650_p5), 0.0  }
  0x10   : > { %s646_s30 = sshll.u32 %s832_s29, 2  ;;  %s667_s8 = sshll.u32 %s832_s29, 6  ;;  %354 = vst [vmem:[#allocation2] sm:$0xff] (!%p650_p5), %v764_v0 }
  0x11   : > { %s839_s11 = scalar_lea.vmem %s890_s0, %s646_s30  ;;  %s844_s14 = scalar_lea.vmem %s891_s1, %s646_s30 }
  0x12   : > { %s849_s17 = scalar_lea.vmem %s892_s2, %s667_s8  ;;  %s344_s20 = scalar_lea.vmem %s893_s3, %s832_s29 }
  0x16 PF: > { %v732_v1 = vld [vmem:[%s849_s17] sm:$0xff]   ;;  %v765_v2 = vmov 0.0   ;;  %v733_v3 = vld [vmem:[%s849_s17 + $0x8] sm:$0xff]   ;;  %vm766_vm0 = vmmov 0   ;;  %v734_v4 = vld [vmem:[%s849_s17 + $0x10] sm:$0xff]   ;;  %vm474_vm1 = vcmask 1043456  }
  0x17   : > { %679 = vmatprep.subr.bf16.mxu0 %v765_v2  ;;  %699 = vmatprep.subr.bf16.mxu1 %v765_v2  ;;  %v735_v5 = vld [vmem:[%s849_s17 + $0x18] sm:$0xff]   ;;  %v736_v6 = vld [vmem:[%s849_s17 + $0x20] sm:$0xff]   ;;  %v737_v7 = vld [vmem:[%s849_s17 + $0x28] sm:$0xff]   ;;  %vm470_vm2 = vcmask 64512   ;;  %p661_p6 = scmp.ne.s32.totalorder %s754_s26, 1 }
  0x18   : > { %680 = vmatpush3.bf16.msra.mxu0 %v732_v1  ;;  %695 = vmatprep.mubr.msk.bf16.mxu0 %vm766_vm0, %v765_v2  ;;  %v738_v8 = vld [vmem:[%s849_s17 + $0x30] sm:$0xff]   ;;  %v739_v9 = vld [vmem:[%s849_s17 + $0x38] sm:$0xff]   ;;  %v355_v10 = vld [vmem:[%s844_s14] sm:$0xf]  ;;  %s541_s29 = sld [smem:[#allocation3]] (!%p661_p6) }
  0x19   : > { %681 = vmatprep.subr.bf16.mxu0 %v765_v2  ;;  %701 = vmatprep.mubr.msk.bf16.mxu1 %vm766_vm0, %v765_v2  ;;  %v461_v17 = vld [vmem:[%s839_s11] sm:$0xf] }
  0x1a   : > { %v659_v18 = vld [vmem:[%s344_s20] ss:$0 sm:$0xff] }
  0x1b   : > { %v460_v19 = vld [vmem:[#allocation2] sm:$0xff] }
  0x1c   : > { %682 = vmatpush3.bf16.msra.mxu0 %v733_v3  ;;  %v662_v27 = vld [vmem:[%s894_s4] ss:$0 sm:$0xff] (!%p661_p6) }
  0x1d   : > { %683 = vmatprep.subr.bf16.mxu0 %v765_v2  ;;  %v663_v28 = vld [vmem:[%s895_s5] ss:$0 sm:$0xff] (!%p661_p6) }
  0x1e   : > { %v543_v31 = vstv (!%p661_p6), %s541_s29 }
  0x20   : > { %684 = vmatpush3.bf16.msra.mxu0 %v734_v4 }
  0x21   : > { %685 = vmatprep.subr.bf16.mxu0 %v765_v2 }
  0x24   : > { %686 = vmatpush3.bf16.msra.mxu0 %v735_v5 }
  0x25   : > { %687 = vmatprep.subr.bf16.mxu0 %v765_v2 }
  0x28   : > { %688 = vmatpush3.bf16.msra.mxu0 %v736_v6 }
  0x29   : > { %689 = vmatprep.subr.bf16.mxu0 %v765_v2 }
  0x2c   : > { %690 = vmatpush3.bf16.msra.mxu0 %v737_v7 }
  0x2d   : > { %691 = vmatprep.subr.bf16.mxu0 %v765_v2 }
  0x30   : > { %692 = vmatpush3.bf16.msra.mxu0 %v738_v8 }
  0x31   : > { %693 = vmatprep.subr.bf16.mxu0 %v765_v2 }
  0x34   : > { %694 = vmatpush3.bf16.msra.mxu0 %v739_v9 }
  0x37   : > { %696 = vmatmul.mubr.bf16.vlgmr.msra.gmra.mrb[0].mxu0 %v355_v10 }
 0x10a   : > { %v454_v11 = vpop.f32.mrb[0].mxu0 }
 0x10b   : > { %v462_v12 = vpack.c.bf16 %v454_v11, %v454_v11  ;;  %v697_v13 = vpop.f32.mrb[1].mxu0 }
 0x10c   : > { %v457_v14 = vpop.f32.mrb[2].mxu0 }
 0x10d   : > { %v698_v15 = vpop.f32.mrb[3].mxu0  ;;  %v476_v16 = vsel %vm474_vm1, %v462_v12, 0 }
 0x10e   : > { %700 = vmatpush3.bf16.msra.mxu1 %v476_v16 }
 0x111   : > { %702 = vmatmul.mubr.msk.bf16.vlgmr.msra.gmra.mrb[0].mxu1 %vm470_vm2, %v461_v17 }
 0x1e3   : > { %523 = sbr.rel (%p661_p6) target bundleno = 505 (0x1f9), region = 56 }
 0x1e4   : > { %v512_v20 = vpop.f32.mrb[0].mxu1 }
 0x1e5   : > { %v513_v21 = vadd.f32 %v659_v18, %v512_v20  ;;  %v703_v22 = vpop.f32.mrb[1].mxu1 }
 0x1e6   : > { %v515_v23 = vpop.f32.mrb[2].mxu1 }
 0x1e7   : > { %v518_v24 = vadd.f32 %v513_v21, %v460_v19  ;;  %v704_v25 = vpop.f32.mrb[3].mxu1 }
 0x1e9   : > { %519 = vst [vmem:[#allocation2] sm:$0xff] %v518_v24 }
 0x1f0   : > { %v524_v26 = vld [vmem:[#allocation2] sm:$0xff] }
 0x1f1   : > { %v532_v29 = vmul.f32 %v662_v27, %v524_v26 }
 0x1f3   : > { %v540_v30 = vadd.f32 %v663_v28, %v532_v29 }
 0x1f5   : > { %vm542_vm3 = vcmp.ge.f32.partialorder %v540_v30, 0.0  ;;  %v544_v32 = vmul.f32 %v543_v31, %v540_v30 }
 0x1f7   : > { %v545_v33 = vsel %vm542_vm3, %v540_v30, %v544_v32 }
 0x1f8   : > { %546 = vst [vmem:[%s897_s7] sm:$0xff] %v545_v33 }
 0x1f9 PF: > { %s18_s28 = sadd.s32 1, %s762_s28   ;;  %s898_s26 = smov %s758_s27 }
 0x1fa   : > { %p15_p7 = scmp.ge.s32.totalorder %s18_s28, 4   ;;  %s899_s27 = smov %s901_s6 }
 0x1fc   :  { %17 = sbr.rel (!%p15_p7) target bundleno = 2 (0x2), region = 95 }

// kernel: model_forward.21
= control target key start
LH: loop header
LB: loop body
LE: loop exit
PB: predicated region body
PF: predicated region fallthrough
CT: control target
= control target key end

     0   :  { %v235_v0 = vmov 0.0   ;;  %vm236_vm0 = vmmov 0   ;;  %s309_s1 = inlined_call_operand.vmem [shape: bf16[128,128], index: 1, kind: input, shape index: {}]   ;;  %s310_s0 = inlined_call_operand.vmem [shape: bf16[16,128], index: 0, kind: input, shape index: {}]   ;;  %s311_s2 = inlined_call_operand.vmem [shape: f32[1,128], index: 2, kind: input, shape index: {}]   ;;  %s312_s3 = inlined_call_operand.vmem [shape: f32[1,128], index: 3, kind: input, shape index: {}]   ;;  %s313_s4 = inlined_call_operand.<no memory space> [shape: f32[1], index: 4, kind: input, shape index: {}]   ;;  %s314_s5 = inlined_call_operand.vmem [shape: f32[16,128], index: 5, kind: output, shape index: {}]  }
   0x1   :  { %204 = vmatprep.subr.bf16.mxu0 %v235_v0  ;;  %v226_v1 = vld [vmem:[%s309_s1] sm:$0xff]   ;;  %220 = vmatprep.mubr.msk.bf16.mxu0 %vm236_vm0, %v235_v0  ;;  %v227_v2 = vld [vmem:[%s309_s1 + $0x8] sm:$0xff]   ;;  %v228_v3 = vld [vmem:[%s309_s1 + $0x10] sm:$0xff]   ;;  %v173_v15 = vstv %s313_s4 }
   0x2   :  { %205 = vmatpush3.bf16.msra.mxu0 %v226_v1  ;;  %v229_v4 = vld [vmem:[%s309_s1 + $0x18] sm:$0xff]   ;;  %v230_v5 = vld [vmem:[%s309_s1 + $0x20] sm:$0xff]   ;;  %v231_v6 = vld [vmem:[%s309_s1 + $0x28] sm:$0xff]  }
   0x3   :  { %206 = vmatprep.subr.bf16.mxu0 %v235_v0  ;;  %v232_v7 = vld [vmem:[%s309_s1 + $0x30] sm:$0xff]   ;;  %v233_v8 = vld [vmem:[%s309_s1 + $0x38] sm:$0xff]   ;;  %v234_v9 = vld [vmem:[%s310_s0] sm:$0xff]  }
   0x4   :  { %v193_v10 = vld [vmem:[%s311_s2] ss:$0 sm:$0xff] }
   0x5   :  { %v194_v12 = vld [vmem:[%s312_s3] ss:$0 sm:$0xff] }
   0x6   :  { %207 = vmatpush3.bf16.msra.mxu0 %v227_v2 }
   0x7   :  { %208 = vmatprep.subr.bf16.mxu0 %v235_v0 }
   0xa   :  { %209 = vmatpush3.bf16.msra.mxu0 %v228_v3 }
   0xb   :  { %210 = vmatprep.subr.bf16.mxu0 %v235_v0 }
   0xe   :  { %211 = vmatpush3.bf16.msra.mxu0 %v229_v4 }
   0xf   :  { %212 = vmatprep.subr.bf16.mxu0 %v235_v0 }
  0x12   :  { %213 = vmatpush3.bf16.msra.mxu0 %v230_v5 }
  0x13   :  { %214 = vmatprep.subr.bf16.mxu0 %v235_v0 }
  0x16   :  { %215 = vmatpush3.bf16.msra.mxu0 %v231_v6 }
  0x17   :  { %216 = vmatprep.subr.bf16.mxu0 %v235_v0 }
  0x1a   :  { %217 = vmatpush3.bf16.msra.mxu0 %v232_v7 }
  0x1b   :  { %218 = vmatprep.subr.bf16.mxu0 %v235_v0 }
  0x1e   :  { %219 = vmatpush3.bf16.msra.mxu0 %v233_v8 }
  0x21   :  { %221 = vmatmul.mubr.bf16.vlgmr.msra.gmra.mrb[0].mxu0 %v234_v9 }
  0xf4   :  { %v136_v11 = vpop.f32.mrb[0].mxu0 }
  0xf5   :  { %v159_v13 = vmul.f32 %v193_v10, %v136_v11  ;;  %v222_v14 = vpop.f32.mrb[1].mxu0 }
  0xf6   :  { %v139_v16 = vpop.f32.mrb[2].mxu0 }
  0xf7   :  { %v168_v17 = vadd.f32 %v194_v12, %v159_v13  ;;  %v160_v18 = vmul.f32 %v193_v10, %v139_v16  ;;  %v223_v19 = vpop.f32.mrb[3].mxu0 }
  0xf9   :  { %vm171_vm1 = vcmp.ge.f32.partialorder %v168_v17, 0.0  ;;  %v174_v20 = vmul.f32 %v173_v15, %v168_v17  ;;  %v169_v21 = vadd.f32 %v194_v12, %v160_v18 }
  0xfb   :  { %v176_v22 = vsel %vm171_vm1, %v168_v17, %v174_v20  ;;  %vm172_vm2 = vcmp.ge.f32.partialorder %v169_v21, 0.0  ;;  %v175_v23 = vmul.f32 %v173_v15, %v169_v21 }
  0xfc   :  { %178 = vst [vmem:[%s314_s5] sm:$0xff] %v176_v22 }
  0xfd   :  { %v177_v24 = vsel %vm172_vm2, %v169_v21, %v175_v23 }
  0xfe   :  { %179 = vst [vmem:[%s314_s5 + $0x8] sm:$0xff] %v177_v24 }

// kernel: model_forward.19
= control target key start
LH: loop header
LB: loop body
LE: loop exit
PB: predicated region body
PF: predicated region fallthrough
CT: control target
= control target key end

     0   :  { %v287_v0 = vmov 0.0   ;;  %vm288_vm0 = vmmov 0   ;;  %vm152_vm1 = vcmask 1043456   ;;  %vm148_vm2 = vcmask 64512   ;;  %s374_s2 = inlined_call_operand.vmem [shape: bf16[1,128,128], index: 2, kind: input, shape index: {}]   ;;  %s375_s1 = inlined_call_operand.vmem [shape: bf16[1,8,128], index: 1, kind: input, shape index: {}]   ;;  %s376_s0 = inlined_call_operand.vmem [shape: bf16[1,8,8], index: 0, kind: input, shape index: {}]   ;;  %s377_s3 = inlined_call_operand.vmem [shape: f32[1,1,128], index: 3, kind: input, shape index: {}]   ;;  %s378_s4 = inlined_call_operand.vmem [shape: f32[1,128], index: 4, kind: input, shape index: {}]   ;;  %s379_s5 = inlined_call_operand.vmem [shape: f32[1,128], index: 5, kind: input, shape index: {}]   ;;  %s380_s6 = inlined_call_operand.<no memory space> [shape: f32[1], index: 6, kind: input, shape index: {}]   ;;  %s381_s7 = inlined_call_operand.vmem [shape: f32[8,128], index: 7, kind: output, shape index: {}]  }
   0x1   :  { %251 = vmatprep.subr.bf16.mxu0 %v287_v0  ;;  %v279_v1 = vld [vmem:[%s374_s2] sm:$0xff]   ;;  %267 = vmatprep.mubr.msk.bf16.mxu0 %vm288_vm0, %v287_v0  ;;  %v280_v2 = vld [vmem:[%s374_s2 + $0x8] sm:$0xff]   ;;  %v281_v3 = vld [vmem:[%s374_s2 + $0x10] sm:$0xff]   ;;  %v220_v26 = vstv %s380_s6 }
   0x2   :  { %271 = vmatprep.subr.bf16.mxu1 %v287_v0  ;;  %273 = vmatprep.mubr.msk.bf16.mxu1 %vm288_vm0, %v287_v0  ;;  %v282_v4 = vld [vmem:[%s374_s2 + $0x18] sm:$0xff]   ;;  %v283_v5 = vld [vmem:[%s374_s2 + $0x20] sm:$0xff]   ;;  %v284_v6 = vld [vmem:[%s374_s2 + $0x28] sm:$0xff]  }
   0x3   :  { %252 = vmatpush3.bf16.msra.mxu0 %v279_v1  ;;  %v285_v7 = vld [vmem:[%s374_s2 + $0x30] sm:$0xff]   ;;  %v286_v8 = vld [vmem:[%s374_s2 + $0x38] sm:$0xff]   ;;  %v33_v9 = vld [vmem:[%s375_s1] sm:$0xf] }
   0x4   :  { %253 = vmatprep.subr.bf16.mxu0 %v287_v0  ;;  %v139_v16 = vld [vmem:[%s376_s0] sm:$0xf] }
   0x5   :  { %v236_v17 = vld [vmem:[%s377_s3] ss:$0 sm:$0xff] }
   0x6   :  { %v238_v19 = vld [vmem:[%s378_s4] ss:$0 sm:$0xff] }
   0x7   :  { %254 = vmatpush3.bf16.msra.mxu0 %v280_v2  ;;  %v239_v22 = vld [vmem:[%s379_s5] ss:$0 sm:$0xff] }
   0x8   :  { %255 = vmatprep.subr.bf16.mxu0 %v287_v0 }
   0xb   :  { %256 = vmatpush3.bf16.msra.mxu0 %v281_v3 }
   0xc   :  { %257 = vmatprep.subr.bf16.mxu0 %v287_v0 }
   0xf   :  { %258 = vmatpush3.bf16.msra.mxu0 %v282_v4 }
  0x10   :  { %259 = vmatprep.subr.bf16.mxu0 %v287_v0 }
  0x13   :  { %260 = vmatpush3.bf16.msra.mxu0 %v283_v5 }
  0x14   :  { %261 = vmatprep.subr.bf16.mxu0 %v287_v0 }
  0x17   :  { %262 = vmatpush3.bf16.msra.mxu0 %v284_v6 }
  0x18   :  { %263 = vmatprep.subr.bf16.mxu0 %v287_v0 }
  0x1b   :  { %264 = vmatpush3.bf16.msra.mxu0 %v285_v7 }
  0x1c   :  { %265 = vmatprep.subr.bf16.mxu0 %v287_v0 }
  0x1f   :  { %266 = vmatpush3.bf16.msra.mxu0 %v286_v8 }
  0x22   :  { %268 = vmatmul.mubr.bf16.vlgmr.msra.gmra.mrb[0].mxu0 %v33_v9 }
  0xf5   :  { %v132_v10 = vpop.f32.mrb[0].mxu0 }
  0xf6   :  { %v140_v11 = vpack.c.bf16 %v132_v10, %v132_v10  ;;  %v269_v12 = vpop.f32.mrb[1].mxu0 }
  0xf7   :  { %v135_v13 = vpop.f32.mrb[2].mxu0 }
  0xf8   :  { %v270_v14 = vpop.f32.mrb[3].mxu0  ;;  %v154_v15 = vsel %vm152_vm1, %v140_v11, 0 }
  0xf9   :  { %272 = vmatpush3.bf16.msra.mxu1 %v154_v15 }
  0xfc   :  { %274 = vmatmul.mubr.msk.bf16.vlgmr.msra.gmra.mrb[0].mxu1 %vm148_vm2, %v139_v16 }
 0x1cf   :  { %v190_v18 = vpop.f32.mrb[0].mxu1 }
 0x1d0   :  { %v191_v20 = vadd.f32 %v236_v17, %v190_v18  ;;  %v275_v21 = vpop.f32.mrb[1].mxu1 }
 0x1d1   :  { %v193_v23 = vpop.f32.mrb[2].mxu1 }
 0x1d2   :  { %v209_v24 = vmul.f32 %v238_v19, %v191_v20  ;;  %v276_v25 = vpop.f32.mrb[3].mxu1 }
 0x1d4   :  { %v217_v27 = vadd.f32 %v239_v22, %v209_v24 }
 0x1d6   :  { %vm219_vm3 = vcmp.ge.f32.partialorder %v217_v27, 0.0  ;;  %v221_v28 = vmul.f32 %v220_v26, %v217_v27 }
 0x1d8   :  { %v222_v29 = vsel %vm219_vm3, %v217_v27, %v221_v28 }
 0x1d9   :  { %223 = vst [vmem:[%s381_s7] sm:$0xff] %v222_v29 }

// kernel: model_forward.22
= control target key start
LH: loop header
LB: loop body
LE: loop exit
PB: predicated region body
PF: predicated region fallthrough
CT: control target
= control target key end

     0   :  { %11 = vsyncpa [#allocation4], 0  ;;  %s825_s21 = smov 0   ;;  %s827_s22 = smov 0   ;;  %s939_s0 = inlined_call_operand.vmem [shape: bf16[4,16,128], index: 0, kind: input, shape index: {}]   ;;  %s940_s1 = inlined_call_operand.vmem [shape: f32[4,1,16], index: 1, kind: input, shape index: {}]   ;;  %s941_s2 = inlined_call_operand.vmem [shape: f32[4,16,1], index: 2, kind: input, shape index: {}]   ;;  %s942_s3 = inlined_call_operand.vmem [shape: bf16[16,16], index: 3, kind: input, shape index: {}]   ;;  %s943_s4 = inlined_call_operand.vmem [shape: f32[4,1,128], index: 4, kind: input, shape index: {}]   ;;  %s944_s5 = inlined_call_operand.vmem [shape: f32[2], index: 5, kind: input, shape index: {}]   ;;  %s945_s6 = inlined_call_operand.vmem [shape: f32[16,128], index: 6, kind: output, shape index: {}]  }
   0x1   :  { %s829_s23 = smov 0  }
   0x2 LB: > { %s661_s24 = sadd.s32 4294967295, %s783_s23   ;;  %s26_s25 = sadd.s32 1, %s779_s22  ;;  %s783_s23 = sphi %s829_s23, %s17_s23   ;;  %s779_s22 = sphi %s827_s22, %s953_s22   ;;  %s775_s21 = sphi %s825_s21, %s952_s21  }
   0x3   : > { %p27_p0 = scmp.ge.s32.totalorder %s26_s25, 4  ;;  %p662_p1 = scmp.ge.s32.totalorder %s783_s23, 1 }
   0x4   : > { %p213_p2 = scmp.lt.s32.totalorder %s783_s23, 5  ;;  %p850_p4 = scmp.eq.s32.totalorder %s661_s24, 0 }
   0x5   : > { %s955_s25 = smov (%p27_p0, %s26_s25), 0  ;;  %s235_s30 = sshll.u32 %s944_s5, 4  ;;  %s236_s30 = int_to_ptr.vmem [resolvable:$true] %s235_s30 }
   0x6   : > { %p846_p3 = pnand %p662_p1, %p213_p2  ;;  %s742_s7 = scalar_lea.vmem %s236_s30, 16 }
   0x7   : > { %p743_p7 = scmp.ne.s32.totalorder %s236_s30, %s742_s7  ;;  %p750_p11 = scmp.lt.s32.totalorder %s236_s30, %s236_s30 }
   0x8   : > { %p697_p5 = pneg %p846_p3  ;;  %p751_p12 = scmp.lt.s32.totalorder %s742_s7, %s742_s7 }
   0xa   : > { %p698_p6 = pnand %p850_p4, %p697_p5  ;;  %p752_p13 = por %p751_p12, %p750_p11 }
   0xc   : > { %p744_p8 = pneg %p698_p6 }
   0xe   : > { %p745_p9 = pnand %p744_p8, %p743_p7 }
  0x10   : > { %p746_p10 = pneg %p745_p9 }
  0x12   : > { %p753_p0 = pnand %p752_p13, %p746_p10 }
  0x14   : > { %756 = shalt.err (!%p753_p0)
}
  0x15   : > { %s785_s8 = smov [#allocation3]   ;;  %281 = sbr.rel (%p846_p3) target bundleno = 736 (0x2e0), region = 44 }
  0x16   : > { %700 = dma.vmem_to_smem (!%p698_p6), %s236_s30, 16, %s785_s8, [#allocation4]  }
  0x1c   : > { %770 = dma.done.wait (%p850_p4), [#allocation4], 16  }
  0x1d   : > { %772 = vsyncadd (%p850_p4), [#allocation4], 4294967280 }
  0x1e   : > { %287 = sfence }
  0x1f   : > { %p332_p1 = scmp.lt.s32.totalorder %s775_s21, 3  ;;  %p672_p2 = scmp.ne.s32.totalorder %s775_s21, 0 }
  0x20   : > { %v786_v0 = vmov (!%p672_p2), 0.0  }
  0x21   : > { %s869_s9 = scalar_select %p332_p1, %s775_s21, 3 }
  0x22   : > { %371 = sbr.rel (%p672_p2) target bundleno = 41 (0x29), region = 52  ;;  %372 = vst [vmem:[#allocation2] sm:$0xff] (!%p672_p2), %v786_v0  ;;  %373 = vst [vmem:[#allocation2 + $0x8] sm:$0xff] (!%p672_p2), %v786_v0 }
  0x23   : > { %s683_s10 = sshll.u32 %s869_s9, 3  ;;  %s339_s13 = scalar_lea.vmem %s940_s1, %s869_s9 }
  0x24   : > { %s879_s16 = scalar_lea.vmem %s939_s0, %s683_s10  ;;  %s684_s17 = sshll.u32 %s869_s9, 4 }
  0x25   : > { %s348_s20 = scalar_lea.vmem %s941_s2, %s684_s17  ;;  %s358_s27 = scalar_lea.vmem %s943_s4, %s869_s9 }
  0x29 PF: > { %v378_v1 = vld [vmem:[%s348_s20] sm:$0xff]  ;;  %v787_v2 = vmov 0   ;;  %v379_v3 = vld [vmem:[%s348_s20 + $0x8] sm:$0xff]  ;;  %vm413_vm4 = vcmask 130048   ;;  %v788_v38 = vmov 0.0   ;;  %vm789_vm7 = vmmov 0  }
  0x2a   : > { %732 = vset.pattern.permute.xlu0 %v787_v2  ;;  %v374_v4 = vld [vmem:[%s942_s3] sm:$0xf]  ;;  %v375_v5 = vld [vmem:[%s942_s3 + $0x4] sm:$0xf]  ;;  %687 = vmatprep.subr.bf16.mxu0 %v788_v38  ;;  %s504_s8 = sld [smem:[#allocation3]]  ;;  %v513_v62 = vld [vmem:[#allocation2 + $0x8] sm:$0xff] }
  0x2b   : > { %383 = vperm.xlu0 %732, %v378_v1   ;;  %vm376_vm0 = vcmp.gt.bf16.partialorder %v374_v4, 0  ;;  %vm377_vm1 = vcmp.gt.bf16.partialorder %v375_v5, 0  ;;  %v673_v7 = vld [vmem:[%s339_s13] ss:$0 sm:$0xff]  ;;  %689 = vmatprep.mubr.msk.bf16.mxu0 %vm789_vm7, %v788_v38  ;;  %p677_p3 = scmp.ne.s32.totalorder %s775_s21, 3 }
  0x2c   : > { %v405_v6 = vsel %vm376_vm0, 65537, %v787_v2  ;;  %v406_v10 = vsel %vm377_vm1, 65537, %v787_v2  ;;  %v733_v37 = vld [vmem:[%s879_s16] sm:$0xff]   ;;  %s678_s9 = sld [smem:[#allocation3 + $0x1]] (!%p677_p3) }
  0x2d   : > { %v407_v8 = vunpack.c.l.b16 %v405_v6  ;;  %v408_v14 = vunpack.c.l.b16 %v406_v10  ;;  %688 = vmatpush3.bf16.msra.mxu0 %v733_v37  ;;  %v674_v50 = vld [vmem:[%s358_s27] ss:$0 sm:$0xff] }
  0x2e   : > { %v512_v57 = vld [vmem:[#allocation2] sm:$0xff] }
  0x2f   : > { %388 = vperm.xlu0 %732, %v379_v3   ;;  %vm896_vm3 = vcmp.ne.s32.totalorder %v407_v8, 0  ;;  %vm903_vm6 = vcmp.ne.s32.totalorder %v408_v14, 0 }
  0x30   : > { %v507_v52 = vstv %s504_s8 }
  0x32   : > { %v529_v6 = vstv (!%p677_p3), %s678_s9 }
  0xaa   : > { %v384_v9 = vpop.permute.xlu0 %383 }
  0xab   : > { %v397_v11 = vadd.f32 %v673_v7, %v384_v9 }
  0xad   : > { %v401_v12 = vmul.f32 0.2, %v397_v11  ;;  %vm399_vm2 = vcmp.ge.f32.partialorder %v397_v11, 0.0 }
  0xae   : > { %v389_v15 = vpop.permute.xlu0 %388 }
  0xaf   : > { %v398_v16 = vadd.f32 %v673_v7, %v389_v15  ;;  %v403_v17 = vsel %vm399_vm2, %v397_v11, %v401_v12 }
  0xb0   : > { %v411_v18 = vsel %vm896_vm3, %v403_v17, -1e+30 }
  0xb1   : > { %v402_v19 = vmul.f32 0.2, %v398_v16  ;;  %v414_v20 = vsel %vm413_vm4, %v411_v18, -inf  ;;  %vm400_vm5 = vcmp.ge.f32.partialorder %v398_v16, 0.0 }
  0xb2   : > { %415 = vmax.xlane.f32.xlu1 %v414_v20 }
  0xb3   : > { %v404_v22 = vsel %vm400_vm5, %v398_v16, %v402_v19 }
  0xb4   : > { %v412_v23 = vsel %vm903_vm6, %v404_v22, -1e+30 }
  0xb5   : > { %v417_v24 = vsel %vm413_vm4, %v412_v23, -inf }
  0xb6   : > { %418 = vmax.xlane.f32.xlu1 %v417_v24 }
 0x13f   : > { %v416_v25 = vpop.xlane.xlu1 %415 }
 0x140   : > { %v420_v26 = vsub.f32 %v411_v18, %v416_v25 }
 0x142   : > { %v422_v27 = vmul.f32 1.442695, %v420_v26 }
 0x143   : > { %v419_v28 = vpop.xlane.xlu1 %418 }
 0x144   : > { %734 = vpow2.f32 %v422_v27  ;;  %v421_v29 = vsub.f32 %v412_v23, %v419_v28 }
 0x146   : > { %v424_v30 = vmul.f32 1.442695, %v421_v29 }
 0x148   : > { %736 = vpow2.f32 %v424_v30 }
 0x14e   : > { %v735_v31 = vpop.eup %734 }
 0x14f   : > { %v426_v32 = vsel %vm896_vm3, %v735_v31, 0.0 }
 0x150   : > { %v428_v33 = vsel %vm413_vm4, %v426_v32, 0.0 }
 0x151   : > { %429 = vadd.xlane.f32.xlu0 %v428_v33 }
 0x152   : > { %v737_v34 = vpop.eup %736 }
 0x153   : > { %v427_v35 = vsel %vm903_vm6, %v737_v34, 0.0 }
 0x154   : > { %v431_v36 = vsel %vm413_vm4, %v427_v35, 0.0 }
 0x155   : > { %432 = vadd.xlane.f32.xlu1 %v431_v36 }
 0x1de   : > { %v430_v39 = vpop.xlane.xlu0 %429 }
 0x1df   : > { %v436_v40 = vmax.f32 %v430_v39, 1e-20  ;;  %vm434_vm8 = vcmp.gt.f32.partialorder %v430_v39, 0.0 }
 0x1e1   : > { %738 = vrcp.f32 %v436_v40 }
 0x1e2   : > { %v433_v41 = vpop.xlane.xlu1 %432 }
 0x1e3   : > { %v437_v42 = vmax.f32 %v433_v41, 1e-20  ;;  %vm435_vm9 = vcmp.gt.f32.partialorder %v433_v41, 0.0 }
 0x1e5   : > { %740 = vrcp.f32 %v437_v42 }
 0x1eb   : > { %v739_v43 = vpop.eup %738 }
 0x1ec   : > { %v440_v44 = vsel %vm434_vm8, %v739_v43, 0.0 }
 0x1ed   : > { %v442_v47 = vmul.f32 %v440_v44, %v426_v32 }
 0x1ef   : > { %v741_v45 = vpop.eup %740 }
 0x1f0   : > { %v441_v46 = vsel %vm435_vm9, %v741_v45, 0.0 }
 0x1f1   : > { %v443_v48 = vmul.f32 %v441_v46, %v427_v35 }
 0x1f3   : > { %v444_v49 = vpack.c.bf16 %v443_v48, %v442_v47 }
 0x1f5   : > { %690 = vmatmul.mubr.msk.bf16.vlgmr.msra.gmra.mrb[0].mxu0 %vm413_vm4, %v444_v49 }
 0x2c8   : > { %v497_v51 = vpop.f32.mrb[0].mxu0 }
 0x2c9   : > { %v498_v53 = vadd.f32 %v674_v50, %v497_v51  ;;  %v691_v54 = vpop.f32.mrb[1].mxu0 }
 0x2ca   : > { %v500_v55 = vpop.f32.mrb[2].mxu0 }
 0x2cb   : > { %vm505_vm10 = vcmp.ge.f32.partialorder %v498_v53, 0.0  ;;  %v508_v56 = vmul.f32 %v507_v52, %v498_v53  ;;  %v501_v58 = vadd.f32 %v674_v50, %v500_v55  ;;  %v692_v59 = vpop.f32.mrb[3].mxu0 }
 0x2cc   : > { %521 = sbr.rel (%p677_p3) target bundleno = 736 (0x2e0), region = 56 }
 0x2cd   : > { %v510_v60 = vsel %vm505_vm10, %v498_v53, %v508_v56  ;;  %vm506_vm11 = vcmp.ge.f32.partialorder %v501_v58, 0.0  ;;  %v509_v61 = vmul.f32 %v507_v52, %v501_v58 }
 0x2ce   : > { %v514_v63 = vadd.f32 %v512_v57, %v510_v60 }
 0x2cf   : > { %v511_v0 = vsel %vm506_vm11, %v501_v58, %v509_v61 }
 0x2d0   : > { %516 = vst [vmem:[#allocation2] sm:$0xff] %v514_v63  ;;  %v515_v1 = vadd.f32 %v513_v62, %v511_v0 }
 0x2d2   : > { %517 = vst [vmem:[#allocation2 + $0x8] sm:$0xff] %v515_v1 }
 0x2d7   : > { %v523_v2 = vld [vmem:[#allocation2] sm:$0xff] }
 0x2d8   : > { %v525_v4 = vmul.f32 0.25, %v523_v2 }
 0x2d9   : > { %v524_v3 = vld [vmem:[#allocation2 + $0x8] sm:$0xff] }
 0x2da   : > { %v526_v5 = vmul.f32 0.25, %v524_v3  ;;  %vm527_vm12 = vcmp.ge.f32.partialorder %v525_v4, 0.0  ;;  %v530_v7 = vmul.f32 %v529_v6, %v525_v4 }
 0x2dc   : > { %vm528_vm13 = vcmp.ge.f32.partialorder %v526_v5, 0.0  ;;  %v531_v8 = vmul.f32 %v529_v6, %v526_v5  ;;  %v532_v9 = vsel %vm527_vm12, %v525_v4, %v530_v7 }
 0x2dd   : > { %534 = vst [vmem:[%s945_s6] sm:$0xff] %v532_v9 }
 0x2de   : > { %v533_v10 = vsel %vm528_vm13, %v526_v5, %v531_v8 }
 0x2df   : > { %535 = vst [vmem:[%s945_s6 + $0x8] sm:$0xff] %v533_v10 }
 0x2e0 PF: > { %s17_s23 = sadd.s32 1, %s783_s23   ;;  %s952_s21 = smov %s779_s22 }
 0x2e1   : > { %p14_p4 = scmp.ge.s32.totalorder %s17_s23, 6   ;;  %s953_s22 = smov %s955_s25 }
 0x2e3   :  { %16 = sbr.rel (!%p14_p4) target bundleno = 2 (0x2), region = 99 }
 0x2ea   :  { %558 = vsyncpa [#allocation4], 1 }
 0x2eb   :  { %560 = vsyncpa [#allocation4 + $0x1], 1 }

// kernel: model_forward.24
= control target key start
LH: loop header
LB: loop body
LE: loop exit
PB: predicated region body
PF: predicated region fallthrough
CT: control target
= control target key end

     0   :  { %v498_v0 = vmov 0.0   ;;  %vm499_vm0 = vmmov 0   ;;  %vm56_vm1 = vcmask 261120   ;;  %vm111_vm2 = vcmask 7168   ;;  %s605_s5 = inlined_call_operand.vmem [shape: bf16[32,128], index: 5, kind: input, shape index: {}]   ;;  %s606_s0 = inlined_call_operand.vmem [shape: bf16[8,32], index: 0, kind: input, shape index: {}]   ;;  %s607_s1 = inlined_call_operand.vmem [shape: bf16[8,32], index: 1, kind: input, shape index: {}]   ;;  %s608_s2 = inlined_call_operand.vmem [shape: bf16[8,32], index: 2, kind: input, shape index: {}]   ;;  %s609_s3 = inlined_call_operand.vmem [shape: bf16[8,32], index: 3, kind: input, shape index: {}]   ;;  %s610_s4 = inlined_call_operand.vmem [shape: bf16[8,32], index: 4, kind: input, shape index: {}]   ;;  %s611_s6 = inlined_call_operand.vmem [shape: f32[1,128], index: 6, kind: input, shape index: {}]   ;;  %s612_s7 = inlined_call_operand.vmem [shape: f32[1,128], index: 7, kind: input, shape index: {}]   ;;  %s613_s8 = inlined_call_operand.vmem [shape: f32[1,5], index: 8, kind: output, shape index: {}]  }
   0x1   :  { %434 = vmatprep.subr.bf16.mxu0 %v498_v0  ;;  %v486_v1 = vld [vmem:[%s605_s5] sm:$0xff]   ;;  %442 = vmatprep.subr.bf16.mxu1 %v498_v0  ;;  %v487_v2 = vld [vmem:[%s605_s5 + $0x8] sm:$0xff]   ;;  %vm399_vm8 = vcmask 32768  }
   0x2   :  { %438 = vmatprep.mubr.msk.bf16.mxu0 %vm499_vm0, %v498_v0  ;;  %446 = vmatprep.mubr.msk.bf16.mxu1 %vm499_vm0, %v498_v0  ;;  %v32_v3 = vld [vmem:[%s606_s0] sm:$0xf] }
   0x3   :  { %435 = vmatpush3.bf16.msra.mxu0 %v486_v1  ;;  %443 = vmatpush3.bf16.msra.mxu1 %v486_v1  ;;  %v131_v4 = vld [vmem:[%s607_s1] sm:$0xf] }
   0x4   :  { %436 = vmatprep.subr.bf16.mxu0 %v498_v0  ;;  %444 = vmatprep.subr.bf16.mxu1 %v498_v0  ;;  %v198_v5 = vld [vmem:[%s608_s2] sm:$0xf] }
   0x5   :  { %v265_v6 = vld [vmem:[%s609_s3] sm:$0xf] }
   0x6   :  { %v332_v7 = vld [vmem:[%s610_s4] sm:$0xf] }
   0x7   :  { %437 = vmatpush3.bf16.msra.mxu0 %v487_v2  ;;  %445 = vmatpush3.bf16.msra.mxu1 %v487_v2  ;;  %v405_v8 = vld [vmem:[%s611_s6] ss:$0 sm:$0xff] }
   0x8   :  { %450 = vmatprep.subr.bf16.mxu0 %v498_v0  ;;  %458 = vmatprep.subr.bf16.mxu1 %v498_v0  ;;  %v409_v29 = vld [vmem:[%s612_s7] ss:$0 sm:$0xff] }
   0xa   :  { %439 = vmatmul.mubr.msk.bf16.vlgmr.msra.gmra.mrb[0].mxu0 %vm56_vm1, %v32_v3  ;;  %447 = vmatmul.mubr.msk.bf16.vlgmr.msra.gmra.mrb[0].mxu1 %vm56_vm1, %v131_v4 }
   0xb   :  { %451 = vmatpush3.bf16.msra.mxu0 %v486_v1  ;;  %459 = vmatpush3.bf16.msra.mxu1 %v486_v1 }
   0xc   :  { %452 = vmatprep.subr.bf16.mxu0 %v498_v0  ;;  %454 = vmatprep.mubr.msk.bf16.mxu0 %vm499_vm0, %v498_v0 }
   0xd   :  { %460 = vmatprep.subr.bf16.mxu1 %v498_v0  ;;  %462 = vmatprep.mubr.msk.bf16.mxu1 %vm499_vm0, %v498_v0 }
   0xf   :  { %453 = vmatpush3.bf16.msra.mxu0 %v487_v2  ;;  %461 = vmatpush3.bf16.msra.mxu1 %v487_v2 }
  0x10   :  { %466 = vmatprep.subr.bf16.mxu0 %v498_v0 }
  0x12   :  { %455 = vmatmul.mubr.msk.bf16.vlgmr.msra.gmra.mrb[4].mxu0 %vm56_vm1, %v198_v5  ;;  %463 = vmatmul.mubr.msk.bf16.vlgmr.msra.gmra.mrb[4].mxu1 %vm56_vm1, %v265_v6 }
  0x13   :  { %467 = vmatpush3.bf16.msra.mxu0 %v486_v1  ;;  %470 = vmatprep.mubr.msk.bf16.mxu0 %vm499_vm0, %v498_v0 }
  0x14   :  { %468 = vmatprep.subr.bf16.mxu0 %v498_v0 }
  0x17   :  { %469 = vmatpush3.bf16.msra.mxu0 %v487_v2 }
  0x1a   :  { %471 = vmatmul.mubr.msk.bf16.vlgmr.msra.gmra.mrb[8].mxu0 %vm56_vm1, %v332_v7 }
  0xdd   :  { %v94_v9 = vpop.f32.mrb[0].mxu0  ;;  %v169_v10 = vpop.f32.mrb[0].mxu1 }
  0xde   :  { %v95_v11 = vadd.f32 %v405_v8, %v94_v9  ;;  %v440_v12 = vpop.f32.mrb[1].mxu0  ;;  %v170_v13 = vadd.f32 %v405_v8, %v169_v10  ;;  %v448_v14 = vpop.f32.mrb[1].mxu1 }
  0xdf   :  { %v97_v15 = vpop.f32.mrb[2].mxu0  ;;  %v172_v16 = vpop.f32.mrb[2].mxu1 }
  0xe0   :  { %488 = vtanh.f32 %v95_v11  ;;  %v441_v17 = vpop.f32.mrb[3].mxu0  ;;  %v449_v18 = vpop.f32.mrb[3].mxu1 }
  0xe1   :  { %490 = vtanh.f32 %v170_v13 }
  0xe5   :  { %v236_v19 = vpop.f32.mrb[4].mxu0  ;;  %v303_v20 = vpop.f32.mrb[4].mxu1 }
  0xe6   :  { %v237_v21 = vadd.f32 %v405_v8, %v236_v19  ;;  %v456_v22 = vpop.f32.mrb[5].mxu0  ;;  %v304_v23 = vadd.f32 %v405_v8, %v303_v20  ;;  %v464_v24 = vpop.f32.mrb[5].mxu1 }
  0xe7   :  { %v239_v25 = vpop.f32.mrb[6].mxu0  ;;  %v306_v26 = vpop.f32.mrb[6].mxu1 }
  0xe8   :  { %492 = vtanh.f32 %v237_v21  ;;  %v457_v27 = vpop.f32.mrb[7].mxu0  ;;  %v465_v28 = vpop.f32.mrb[7].mxu1 }
  0xe9   :  { %494 = vtanh.f32 %v304_v23  ;;  %v30_v27 = vlaneseq }
  0xea   :  { %v489_v30 = vpop.eup %488 }
  0xeb   :  { %v491_v31 = vpop.eup %490  ;;  %v108_v32 = vmul.f32 %v489_v30, %v409_v29  ;;  %v31_v28 = vand.u32 127, %v30_v27 }
  0xec   :  { %v176_v34 = vmul.f32 %v491_v31, %v409_v29 }
  0xed   :  { %109 = vadd.xlane.f32.xlu0 %v108_v32  ;;  %v370_v33 = vpop.f32.mrb[8].mxu0  ;;  %vm192_vm3 = vcmp.eq.s32.totalorder %v31_v28, 1  ;;  %vm125_vm4 = vcmp.eq.s32.totalorder %v31_v28, 0  ;;  %vm259_vm5 = vcmp.eq.s32.totalorder %v31_v28, 2  ;;  %vm326_vm6 = vcmp.eq.s32.totalorder %v31_v28, 3 }
  0xee   :  { %v371_v35 = vadd.f32 %v405_v8, %v370_v33  ;;  %v472_v36 = vpop.f32.mrb[9].mxu0  ;;  %v410_v31 = vsel %vm125_vm4, 1.0, %v498_v0  ;;  %v414_v33 = vsel %vm259_vm5, 1.0, %v498_v0  ;;  %vm393_vm7 = vcmp.eq.s32.totalorder %v31_v28, 4 }
  0xef   :  { %v373_v37 = vpop.f32.mrb[10].mxu0  ;;  %v416_v36 = vsel %vm326_vm6, 1.0, %v498_v0 }
  0xf0   :  { %496 = vtanh.f32 %v371_v35  ;;  %v473_v38 = vpop.f32.mrb[11].mxu0 }
  0xf1   :  { %177 = vadd.xlane.f32.xlu0 %v176_v34 }
  0xf2   :  { %v493_v39 = vpop.eup %492 }
  0xf3   :  { %v495_v40 = vpop.eup %494  ;;  %v243_v41 = vmul.f32 %v493_v39, %v409_v29 }
  0xf4   :  { %v310_v42 = vmul.f32 %v495_v40, %v409_v29 }
  0xf5   :  { %244 = vadd.xlane.f32.xlu1 %v243_v41 }
  0xf9   :  { %311 = vadd.xlane.f32.xlu1 %v310_v42  ;;  %v418_v42 = vsel %vm393_vm7, 1.0, %v498_v0 }
  0xfa   :  { %v497_v43 = vpop.eup %496 }
  0xfb   :  { %v377_v44 = vmul.f32 %v497_v43, %v409_v29  ;;  %v412_v29 = vsel %vm192_vm3, 1.0, %v498_v0 }
  0xfd   :  { %378 = vadd.xlane.f32.xlu0 %v377_v44 }
 0x17a   :  { %v110_v45 = vpop.xlane.xlu0 %109 }
 0x17b   :  { %v112_v46 = vsel %vm111_vm2, %v110_v45, 0.0 }
 0x17c   :  { %113 = vadd.xlane.f32.xlu1 %v112_v46 }
 0x17e   :  { %v178_v47 = vpop.xlane.xlu0 %177 }
 0x17f   :  { %v179_v48 = vsel %vm111_vm2, %v178_v47, 0.0 }
 0x180   :  { %180 = vadd.xlane.f32.xlu0 %v179_v48 }
 0x182   :  { %v245_v49 = vpop.xlane.xlu1 %244 }
 0x183   :  { %v246_v50 = vsel %vm111_vm2, %v245_v49, 0.0 }
 0x184   :  { %247 = vadd.xlane.f32.xlu1 %v246_v50 }
 0x186   :  { %v312_v51 = vpop.xlane.xlu1 %311 }
 0x187   :  { %v313_v52 = vsel %vm111_vm2, %v312_v51, 0.0 }
 0x188   :  { %314 = vadd.xlane.f32.xlu0 %v313_v52 }
 0x18a   :  { %v379_v53 = vpop.xlane.xlu0 %378 }
 0x18b   :  { %v380_v54 = vsel %vm111_vm2, %v379_v53, 0.0 }
 0x18c   :  { %381 = vadd.xlane.f32.xlu1 %v380_v54 }
 0x209   :  { %v114_v55 = vpop.xlane.xlu1 %113 }
 0x20a   :  { %v115_v56 = vrot.slane %v114_v55, 4 }
 0x20c   :  { %v116_v57 = vadd.f32 %v115_v56, %v114_v55 }
 0x20d   :  { %v181_v58 = vpop.xlane.xlu0 %180 }
 0x20e   :  { %v117_v59 = vrot.slane %v116_v57, 2  ;;  %v182_v60 = vrot.slane %v181_v58, 4 }
 0x210   :  { %v183_v61 = vadd.f32 %v182_v60, %v181_v58  ;;  %v118_v62 = vadd.f32 %v117_v59, %v116_v57 }
 0x211   :  { %v248_v63 = vpop.xlane.xlu1 %247 }
 0x212   :  { %v184_v1 = vrot.slane %v183_v61, 2  ;;  %v249_v2 = vrot.slane %v248_v63, 4  ;;  %v119_v3 = vrot.slane %v118_v62, 1 }
 0x214   :  { %v250_v4 = vadd.f32 %v249_v2, %v248_v63  ;;  %v120_v5 = vadd.f32 %v119_v3, %v118_v62  ;;  %v185_v6 = vadd.f32 %v184_v1, %v183_v61 }
 0x215   :  { %v315_v7 = vpop.xlane.xlu0 %314 }
 0x216   :  { %v251_v8 = vrot.slane %v250_v4, 2  ;;  %v316_v9 = vrot.slane %v315_v7, 4  ;;  %474 = vpush %v120_v5  ;;  %v186_v10 = vrot.slane %v185_v6, 1 }
 0x218   :  { %v317_v11 = vadd.f32 %v316_v9, %v315_v7  ;;  %v187_v12 = vadd.f32 %v186_v10, %v185_v6  ;;  %v252_v13 = vadd.f32 %v251_v8, %v250_v4 }
 0x219   :  { %v382_v14 = vpop.xlane.xlu1 %381 }
 0x21a   :  { %v318_v15 = vrot.slane %v317_v11, 2  ;;  %v383_v16 = vrot.slane %v382_v14, 4  ;;  %476 = vpush %v187_v12  ;;  %v253_v17 = vrot.slane %v252_v13, 1 }
 0x21c   :  { %v319_v18 = vadd.f32 %v318_v15, %v317_v11  ;;  %v384_v19 = vadd.f32 %v383_v16, %v382_v14  ;;  %v254_v20 = vadd.f32 %v253_v17, %v252_v13 }
 0x21e   :  { %v385_v21 = vrot.slane %v384_v19, 2  ;;  %478 = vpush %v254_v20  ;;  %v320_v22 = vrot.slane %v319_v18, 1 }
 0x220   :  { %v386_v23 = vadd.f32 %v385_v21, %v384_v19  ;;  %v321_v24 = vadd.f32 %v320_v22, %v319_v18 }
 0x222   :  { %480 = vpush %v321_v24  ;;  %v387_v25 = vrot.slane %v386_v23, 1 }
 0x224   :  { %v388_v26 = vadd.f32 %v387_v25, %v386_v23 }
 0x226   :  { %482 = vpush %v388_v26 }
 0x247   :  { %s475_s7 = spop %474 }
 0x248   :  { %s124_s18 = smul.f32 0.125, %s475_s7 }
 0x24a   :  { %v128_v32 = vstv %s124_s18 }
 0x24b   :  { %s477_s16 = spop %476  ;;  %v129_v37 = vmul.f32 %v410_v31, %v128_v32 }
 0x24c   :  { %s191_s17 = smul.f32 0.125, %s477_s16 }
 0x24e   :  { %v195_v30 = vstv %s191_s17 }
 0x24f   :  { %s479_s19 = spop %478  ;;  %v196_v35 = vmul.f32 %v412_v29, %v195_v30 }
 0x250   :  { %s258_s20 = smul.f32 0.125, %s479_s19 }
 0x251   :  { %v197_v40 = vadd.f32 %v196_v35, %v129_v37 }
 0x252   :  { %v262_v34 = vstv %s258_s20 }
 0x253   :  { %s481_s21 = spop %480  ;;  %v263_v38 = vmul.f32 %v414_v33, %v262_v34 }
 0x254   :  { %s325_s22 = smul.f32 0.125, %s481_s21 }
 0x255   :  { %v264_v43 = vadd.f32 %v263_v38, %v197_v40 }
 0x256   :  { %v329_v39 = vstv %s325_s22 }
 0x257   :  { %v330_v41 = vmul.f32 %v416_v36, %v329_v39  ;;  %s483_s23 = spop %482 }
 0x258   :  { %s392_s24 = smul.f32 0.125, %s483_s23 }
 0x259   :  { %v331_v45 = vadd.f32 %v330_v41, %v264_v43 }
 0x25a   :  { %v396_v44 = vstv %s392_s24 }
 0x25b   :  { %v397_v46 = vmul.f32 %v418_v42, %v396_v44 }
 0x25d   :  { %v398_v47 = vadd.f32 %v397_v46, %v331_v45 }
 0x25f   :  { %400 = vst.msk [vmem:[%s613_s8] sm:$0x1] %vm399_vm8, %v398_v47 }

// kernel: model_forward.25
= control target key start
LH: loop header
LB: loop body
LE: loop exit
PB: predicated region body
PF: predicated region fallthrough
CT: control target
= control target key end

     0   :  { %v212_v1 = vmov 0.0   ;;  %vm213_vm0 = vmmov 0   ;;  %s262_s0 = inlined_call_operand.vmem [shape: bf16[8,32], index: 0, kind: input, shape index: {}]   ;;  %s263_s1 = inlined_call_operand.vmem [shape: bf16[32,32], index: 1, kind: input, shape index: {}]   ;;  %s264_s2 = inlined_call_operand.vmem [shape: bf16[32,8], index: 2, kind: input, shape index: {}]   ;;  %s265_s3 = inlined_call_operand.hbm [shape: f32[8,8], index: 3, kind: output, shape index: {}]  }
   0x1   :  { %v184_v0 = vld [vmem:[%s263_s1] sm:$0xff]   ;;  %165 = vmatprep.subr.bf16.mxu0 %v212_v1  ;;  %173 = vmatprep.subr.bf16.mxu1 %v212_v1  ;;  %v185_v2 = vld [vmem:[%s263_s1 + $0x8] sm:$0xff]  }
   0x2   :  { %166 = vmatpush3.bf16.msra.mxu0 %v184_v0  ;;  %169 = vmatprep.mubr.msk.bf16.mxu0 %vm213_vm0, %v212_v1  ;;  %v186_v3 = vld [vmem:[%s264_s2] sm:$0xff]  }
   0x3   :  { %167 = vmatprep.subr.bf16.mxu0 %v212_v1  ;;  %177 = vmatprep.mubr.msk.bf16.mxu1 %vm213_vm0, %v212_v1 }
   0x4   :  { %174 = vmatpush3.bf16.msra.mxu1 %v186_v3 }
   0x5   :  { %8 = vsyncpa [#allocation3], 0  ;;  %175 = vmatprep.subr.bf16.mxu1 %v212_v1  ;;  %v16_v4 = vld [vmem:[%s262_s0] sm:$0xf]  ;;  %vm33_vm1 = vcmask 261120   ;;  %v187_v5 = vld [vmem:[%s264_s2 + $0x8] sm:$0xff]  }
   0x6   :  { %168 = vmatpush3.bf16.msra.mxu0 %v185_v2  ;;  %s214_s21 = smov [#allocation2]   ;;  %vm137_vm2 = vcmask 64512  }
   0x7   :  { %s145_s22 = sshll.u32 %s214_s21, 4  ;;  %s146_s22 = int_to_ptr.vmem [resolvable:$true] %s145_s22 }
   0x8   :  { %176 = vmatpush3.bf16.msra.mxu1 %v187_v5  ;;  %s188_s0 = scalar_lea.vmem %s146_s22, 128  ;;  %p193_p1 = scmp.lt.s32.totalorder %s146_s22, %s146_s22 }
   0x9   :  { %170 = vmatmul.mubr.msk.bf16.vlgmr.msra.gmra.mrb[0].mxu0 %vm33_vm1, %v16_v4  ;;  %p189_p0 = scmp.ne.s32.totalorder %s146_s22, %s188_s0  ;;  %p194_p2 = scmp.lt.s32.totalorder %s188_s0, %s188_s0 }
   0xb   :  { %p195_p3 = por %p194_p2, %p193_p1 }
   0xd   :  { %p196_p4 = pnand %p195_p3, %p189_p0 }
  0xdc   :  { %v71_v6 = vpop.f32.mrb[0].mxu0 }
  0xdd   :  { %v77_v7 = vpack.c.bf16 %v71_v6, %v71_v6  ;;  %v171_v8 = vpop.f32.mrb[1].mxu0 }
  0xde   :  { %v74_v9 = vpop.f32.mrb[2].mxu0 }
  0xdf   :  { %v172_v10 = vpop.f32.mrb[3].mxu0  ;;  %178 = vmatmul.mubr.msk.bf16.vlgmr.msra.gmra.mrb[0].mxu1 %vm33_vm1, %v77_v7 }
 0x1b2   :  { %v131_v11 = vpop.f32.mrb[0].mxu1 }
 0x1b3   :  { %138 = vst.msk [vmem:[#allocation2] sm:$0xff] %vm137_vm2, %v131_v11  ;;  %v179_v12 = vpop.f32.mrb[1].mxu1 }
 0x1b4   :  { %v134_v13 = vpop.f32.mrb[2].mxu1 }
 0x1b5   :  { %199 = shalt.err (!%p196_p4)
}
 0x1b6   :  { %s200_s24 = scalar_lea.hbm %s265_s3, 128 }
 0x1b7   :  { %p201_p5 = scmp.ne.s32.totalorder %s265_s3, %s200_s24  ;;  %p204_p6 = scmp.lt.u32.totalorder %s200_s24, %s265_s3 }
 0x1b9   :  { %p206_p7 = pnand %p204_p6, %p201_p5 }
 0x1bb   :  { %209 = shalt.err (!%p206_p7)
}
 0x1bc   :  { %148 = dma.vmem_to_hbm [thread:$0]  %s146_s22, 128, %s265_s3, [#allocation3]   ;;  %v180_v14 = vpop.f32.mrb[3].mxu1 }
 0x1bd   :  { %210 = dma.done.wait [#allocation3], 128  }
 0x1be   :  { %211 = vsyncadd [#allocation3], 4294967168 }
 0x1bf   :  { %152 = vsyncpa [#allocation3], 1 }

</bundles_post_ra>
